<compile_context>
chip_gen: v7x
topology: tpu7x:2x2x1
jax: 0.10.0
libtpu: 0.0.40
codegen_flags: <defaults>
</compile_context>

<pallas_src>
import functools

import jax
import jax.numpy as jnp
from jax.experimental import pallas as pl
from jax.experimental.pallas import tpu as pltpu


def _mlp_kernel(x_ref, w_in_ref, b_in_ref, w_hid_ref, b_hid_ref,
                w_out_ref, b_out_ref, o_ref, *, act_dtype):
    """Fused MLP in transposed (features, batch-lanes) layout.

    Computes y^T = W_out tanh(... tanh(W_in x^T + b_in) ...) + b_out, where all
    W are block-diagonal lane-packed copies of the per-sample weights.
    Dropout1d(p=0.1) before even-indexed hidden blocks is identity at eval.
    """
    mxu_dtype = w_hid_ref.dtype  # bf16 (default) or f32; accumulation always f32.

    # First layer kept in f32: K = P*input_dim is tiny, preserves input precision.
    a = jnp.dot(w_in_ref[...], x_ref[...],
                preferred_element_type=jnp.float32) + b_in_ref[...]
    h = jnp.tanh(a.astype(act_dtype))

    # Hidden layers, statically unrolled (num_layers is small and fixed).
    num_hidden = w_hid_ref.shape[0]
    for i in range(num_hidden):
        a = jnp.dot(w_hid_ref[i], h.astype(mxu_dtype),
                    preferred_element_type=jnp.float32) + b_hid_ref[i]
        h = jnp.tanh(a.astype(act_dtype))

    # Output layer.
    out = jnp.dot(w_out_ref[...], h.astype(mxu_dtype),
                  preferred_element_type=jnp.float32) + b_out_ref[...]
    o_ref[...] = out.astype(o_ref.dtype)


def _block_diag(w, p):
    """Tile w (..., a, b) into block-diagonal (..., p*a, p*b) with p copies of w."""
    *lead, a, b = w.shape
    eye = jnp.eye(p, dtype=w.dtype)
    out = jnp.einsum("pq,...ab->...paqb", eye, w)
    return out.reshape(*lead, p * a, p * b)


def pack_params(params, *, mxu_dtype=jnp.bfloat16):
    """One-time weight prep: block-diagonal lane packing + MXU dtype casts.

    Call ONCE per parameter set and reuse across vector_field_mlp calls (this is
    the hoisted prep an ODE-solver loop should amortize).

    Weights follow the PyTorch nn.Linear convention: w is (out_features,
    in_features), b is (out_features,).  The kernel computes y^T = W x^T + b,
    so PyTorch-orientation weights are used directly (no transpose needed).
    """
    hidden, input_dim = params["w_in"].shape
    # Lane-packing factor: pack P samples per 128-lane group.
    # NOTE: pack == 1 (hidden not dividing 128) is a silent perf cliff -- only
    # `hidden` of 128 lanes are active in the hidden layers.  Still correct.
    pack = 128 // hidden if (hidden <= 128 and 128 % hidden == 0) else 1

    def tile_b(b):  # (..., out) -> (..., pack*out, 1): rows match the block-diag.
        reps = (1,) * (b.ndim - 1) + (pack,)
        return jnp.tile(b, reps).astype(jnp.float32)[..., None]

    return {
        "pack": pack, "input_dim": input_dim, "hidden": hidden,
        # First layer stays f32 (tiny K; keeps input precision on the bf16 path).
        "w_in": _block_diag(params["w_in"], pack).astype(jnp.float32),
        "b_in": tile_b(params["b_in"]),
        "w_hid": _block_diag(params["w_hid"], pack).astype(mxu_dtype),
        "b_hid": tile_b(params["b_hid"]),
        "w_out": _block_diag(params["w_out"], pack).astype(mxu_dtype),
        "b_out": tile_b(params["b_out"]),
    }


def _round_up(x, m):
    return ((x + m - 1) // m) * m


def _default_act_dtype():
    """bf16 tanh/bias-add on v6e/v7x (bf16 EUP/VPU); f32 on <= v5."""
    try:
        kind = jax.devices()[0].device_kind.lower()
    except Exception:
        return jnp.float32
    if any(v in kind for v in ("v2", "v3", "v4", "v5")):
        return jnp.float32
    return jnp.bfloat16


def vector_field_mlp(x, packed, *, tile_rows=4096, act_dtype=None):
    """Fused VectorFieldMLP forward pass (the module's `t` argument is ignored).

    x: (batch, input_dim) float32; packed: output of pack_params().
    """
    if act_dtype is None:
        act_dtype = _default_act_dtype()

    batch, input_dim = x.shape
    assert input_dim == packed["input_dim"]
    pack, hidden = packed["pack"], packed["hidden"]
    num_hidden = packed["w_hid"].shape[0]
    in_p, hid_p = pack * input_dim, pack * hidden

    # --- Batch tiling: packed rows live on the lane axis => granularity 128. ---
    rows = _round_up((batch + pack - 1) // pack, 128)
    tile_rows = max(128, (tile_rows // 128) * 128)
    if rows <= 128:
        tr = 128                                   # single minimal tile
    else:
        # Guarantee >= 2 grid steps whenever possible so both v7x TensorCores work.
        tr = min(tile_rows, _round_up((rows + 1) // 2, 128))
    rows_pad = _round_up(rows, tr)
    grid = (rows_pad // tr,)

    batch_pad = rows_pad * pack
    x_in = x if batch_pad == batch else jnp.pad(x, ((0, batch_pad - batch), (0, 0)))
    # Pack `pack` samples per row, then transpose so batch is the lane axis
    # (lane-dense input AND output slabs; wrapper-side layout plumbing only).
    x_t = x_in.reshape(rows_pad, in_p).T           # (in_p, rows_pad)

    def full(shape):
        return pl.BlockSpec(shape, lambda i: (0,) * len(shape))

    # Advisory cost hint for XLA scheduling around the custom call.
    flops = 2 * rows_pad * (2 * hid_p * in_p + num_hidden * hid_p * hid_p)
    transcendentals = rows_pad * hid_p * (num_hidden + 1)
    bytes_accessed = (x_t.size + rows_pad * in_p) * 4 + sum(
        int(packed[k].size) * packed[k].dtype.itemsize
        for k in ("w_in", "b_in", "w_hid", "b_hid", "w_out", "b_out"))

    out_t = pl.pallas_call(
        functools.partial(_mlp_kernel, act_dtype=act_dtype),
        out_shape=jax.ShapeDtypeStruct((in_p, rows_pad), x.dtype),
        grid_spec=pltpu.PrefetchScalarGridSpec(
            num_scalar_prefetch=0,
            grid=grid,
            in_specs=[
                pl.BlockSpec((in_p, tr), lambda i: (0, i)),   # x^T batch tile
                full((hid_p, in_p)),                           # w_in  (block-diag, f32)
                full((hid_p, 1)),                              # b_in
                full((num_hidden, hid_p, hid_p)),              # w_hid (block-diag)
                full((num_hidden, hid_p, 1)),                  # b_hid
                full((in_p, hid_p)),                           # w_out (block-diag)
                full((in_p, 1)),                               # b_out
            ],
            out_specs=pl.BlockSpec((in_p, tr), lambda i: (0, i)),
        ),
        compiler_params=pltpu.CompilerParams(
            dimension_semantics=("parallel",),
        ),
        cost_estimate=pl.CostEstimate(
            flops=flops, transcendentals=transcendentals,
            bytes_accessed=bytes_accessed),
    )(x_t, packed["w_in"], packed["b_in"], packed["w_hid"], packed["b_hid"],
      packed["w_out"], packed["b_out"])

    # Un-transpose / un-pack and drop batch padding (contiguous reshape).
    return out_t.T.reshape(batch_pad, input_dim)[:batch]


def init_params(key, input_dim, hidden_dim, num_layers=5):
    """nn.Linear-style init: uniform(-1/sqrt(fan_in), 1/sqrt(fan_in)).

    Weights in PyTorch convention: w (out_features, in_features), b (out_features,)."""
    ks = jax.random.split(key, 4 + 2 * num_layers)

    def lin(kw, kb, fan_in, fan_out):
        bound = 1.0 / float(jnp.sqrt(jnp.float32(fan_in)))
        w = jax.random.uniform(kw, (fan_out, fan_in), jnp.float32, -bound, bound)
        b = jax.random.uniform(kb, (fan_out,), jnp.float32, -bound, bound)
        return w, b

    w_in, b_in = lin(ks[0], ks[1], input_dim, hidden_dim)
    w_hid, b_hid = [], []
    for i in range(num_layers):
        w, b = lin(ks[2 + 2 * i], ks[3 + 2 * i], hidden_dim, hidden_dim)
        w_hid.append(w)
        b_hid.append(b)
    w_out, b_out = lin(ks[2 + 2 * num_layers], ks[3 + 2 * num_layers],
                       hidden_dim, input_dim)
    return {
        "w_in": w_in, "b_in": b_in,
        "w_hid": jnp.stack(w_hid), "b_hid": jnp.stack(b_hid),
        "w_out": w_out, "b_out": b_out,
    }


def _reference(x, p):
    h = jnp.tanh(x @ p["w_in"].T + p["b_in"])
    for i in range(p["w_hid"].shape[0]):
        h = jnp.tanh(h @ p["w_hid"][i].T + p["b_hid"][i])
    return h @ p["w_out"].T + p["b_out"]


if __name__ == "__main__":
    key = jax.random.PRNGKey(0)
    k_param, k_x, k_t = jax.random.split(key, 3)

    input_dim, hidden_dim, num_layers = 4, 32, 5
    batch = 8

    params = init_params(k_param, input_dim, hidden_dim, num_layers)
    x = jax.random.normal(k_x, (batch, input_dim), jnp.float32)
    t = jax.random.normal(k_t, (batch, 1), jnp.float32)  # ignored, like the module

    ref = _reference(x, params)

    # Hoisted one-time weight packing (reused across calls, as an ODE solver would).
    packed_bf16 = pack_params(params)                       # default: bf16 MXU inputs
    packed_f32 = pack_params(params, mxu_dtype=jnp.float32)  # numerics-check path

    # Default fast path: bf16 MXU, f32 accumulate, tanh dtype auto (bf16 on v6e/v7x).
    out = jax.block_until_ready(vector_field_mlp(x, packed_bf16))
    assert out.shape == (batch, input_dim)
    assert jnp.allclose(out, ref, atol=1e-1, rtol=1e-1), "bf16 path mismatch"

    # Full-f32 path: tight-tolerance check against the pure-JAX reference.
    out_f32 = jax.block_until_ready(
        vector_field_mlp(x, packed_f32, act_dtype=jnp.float32))
    assert out_f32.shape == (batch, input_dim)
    assert jnp.allclose(out_f32, ref, atol=1e-4, rtol=1e-4), "f32 path mismatch"

    # Multi-tile / padded-batch path: batch not a multiple of pack and grid > 1
    # (exercises pipelining + the "parallel" megacore-sharded grid axis).
    batch2 = 3001
    x2 = jax.random.normal(k_x, (batch2, input_dim), jnp.float32)
    out2 = jax.block_until_ready(
        vector_field_mlp(x2, packed_f32, tile_rows=128, act_dtype=jnp.float32))
    ref2 = _reference(x2, params)
    assert out2.shape == (batch2, input_dim)
    assert jnp.allclose(out2, ref2, atol=1e-4, rtol=1e-4), "multi-tile mismatch"

    print("KERNEL_OK")
</pallas_src>

<mosaic_0001>
module attributes {stable_mosaic.version = 11 : i64} {
  func.func @_mlp_kernel(%arg0: i32, %arg1: memref<16x128xf32, #tpu.memory_space<vmem>>, %arg2: memref<128x16xf32, #tpu.memory_space<vmem>>, %arg3: memref<128x1xf32, #tpu.memory_space<vmem>>, %arg4: memref<5x128x128xbf16, #tpu.memory_space<vmem>>, %arg5: memref<5x128x1xf32, #tpu.memory_space<vmem>>, %arg6: memref<16x128xbf16, #tpu.memory_space<vmem>>, %arg7: memref<16x1xf32, #tpu.memory_space<vmem>>, %arg8: memref<16x128xf32, #tpu.memory_space<vmem>>) attributes {dimension_semantics = [#tpu.dimension_semantics<parallel>], iteration_bounds = array<i64: 1>, scalar_prefetch = 0 : i64, scratch_operands = 0 : i64, tpu.core_type = #tpu.core_type<tc>, window_params = [{transform_indices = @transform_0, window_bounds = array<i64: 16, 128>}, {pipeline_mode = #tpu.pipeline_mode<synchronous>, transform_indices = @transform_1, window_bounds = array<i64: 128, 16>}, {pipeline_mode = #tpu.pipeline_mode<synchronous>, transform_indices = @transform_2, window_bounds = array<i64: 128, 1>}, {pipeline_mode = #tpu.pipeline_mode<synchronous>, transform_indices = @transform_3, window_bounds = array<i64: 5, 128, 128>}, {pipeline_mode = #tpu.pipeline_mode<synchronous>, transform_indices = @transform_4, window_bounds = array<i64: 5, 128, 1>}, {pipeline_mode = #tpu.pipeline_mode<synchronous>, transform_indices = @transform_5, window_bounds = array<i64: 16, 128>}, {pipeline_mode = #tpu.pipeline_mode<synchronous>, transform_indices = @transform_6, window_bounds = array<i64: 16, 1>}, {transform_indices = @transform_7, window_bounds = array<i64: 16, 128>}]} {
    %c0 = arith.constant 0 : index
    %c0_0 = arith.constant 0 : index
    %0 = vector.load %arg2[%c0, %c0_0] : memref<128x16xf32, #tpu.memory_space<vmem>>, vector<128x16xf32>
    %c0_1 = arith.constant 0 : index
    %c0_2 = arith.constant 0 : index
    %1 = vector.load %arg1[%c0_1, %c0_2] : memref<16x128xf32, #tpu.memory_space<vmem>>, vector<16x128xf32>
    %cst = arith.constant dense<0.000000e+00> : vector<128x128xf32>
    %2 = tpu.matmul %0, %1, %cst {dimension_numbers = #tpu.dot_dimension_numbers<[1], [0], [0], [1], [0, 0, 1, 1], [], []>} : vector<128x16xf32>, vector<16x128xf32>, vector<128x128xf32> -> vector<128x128xf32>
    %c0_3 = arith.constant 0 : index
    %c0_4 = arith.constant 0 : index
    %3 = vector.load %arg3[%c0_3, %c0_4] : memref<128x1xf32, #tpu.memory_space<vmem>>, vector<128x1xf32>
    %4 = vector.broadcast %3 : vector<128x1xf32> to vector<128x128xf32>
    %5 = arith.addf %2, %4 : vector<128x128xf32>
    %6 = arith.truncf %5 : vector<128x128xf32> to vector<128x128xbf16>
    %7 = math.tanh %6 : vector<128x128xbf16>
    %c0_5 = arith.constant 0 : index
    %c0_6 = arith.constant 0 : index
    %c0_7 = arith.constant 0 : index
    %8 = vector.load %arg4[%c0_5, %c0_6, %c0_7] : memref<5x128x128xbf16, #tpu.memory_space<vmem>>, vector<1x128x128xbf16>
    %9 = vector.shape_cast %8 : vector<1x128x128xbf16> to vector<128x128xbf16>
    %cst_8 = arith.constant dense<0.000000e+00> : vector<128x128xf32>
    %10 = tpu.matmul %9, %7, %cst_8 {dimension_numbers = #tpu.dot_dimension_numbers<[1], [0], [0], [1], [0, 0, 1, 1], [], []>} : vector<128x128xbf16>, vector<128x128xbf16>, vector<128x128xf32> -> vector<128x128xf32>
    %c0_9 = arith.constant 0 : index
    %c0_10 = arith.constant 0 : index
    %c0_11 = arith.constant 0 : index
    %11 = vector.load %arg5[%c0_9, %c0_10, %c0_11] : memref<5x128x1xf32, #tpu.memory_space<vmem>>, vector<1x128x1xf32>
    %12 = vector.shape_cast %11 : vector<1x128x1xf32> to vector<128x1xf32>
    %13 = vector.broadcast %12 : vector<128x1xf32> to vector<128x128xf32>
    %14 = arith.addf %10, %13 : vector<128x128xf32>
    %15 = arith.truncf %14 : vector<128x128xf32> to vector<128x128xbf16>
    %16 = math.tanh %15 : vector<128x128xbf16>
    %c1 = arith.constant 1 : index
    %c0_12 = arith.constant 0 : index
    %c0_13 = arith.constant 0 : index
    %17 = vector.load %arg4[%c1, %c0_12, %c0_13] : memref<5x128x128xbf16, #tpu.memory_space<vmem>>, vector<1x128x128xbf16>
    %18 = vector.shape_cast %17 : vector<1x128x128xbf16> to vector<128x128xbf16>
    %cst_14 = arith.constant dense<0.000000e+00> : vector<128x128xf32>
    %19 = tpu.matmul %18, %16, %cst_14 {dimension_numbers = #tpu.dot_dimension_numbers<[1], [0], [0], [1], [0, 0, 1, 1], [], []>} : vector<128x128xbf16>, vector<128x128xbf16>, vector<128x128xf32> -> vector<128x128xf32>
    %c1_15 = arith.constant 1 : index
    %c0_16 = arith.constant 0 : index
    %c0_17 = arith.constant 0 : index
    %20 = vector.load %arg5[%c1_15, %c0_16, %c0_17] : memref<5x128x1xf32, #tpu.memory_space<vmem>>, vector<1x128x1xf32>
    %21 = vector.shape_cast %20 : vector<1x128x1xf32> to vector<128x1xf32>
    %22 = vector.broadcast %21 : vector<128x1xf32> to vector<128x128xf32>
    %23 = arith.addf %19, %22 : vector<128x128xf32>
    %24 = arith.truncf %23 : vector<128x128xf32> to vector<128x128xbf16>
    %25 = math.tanh %24 : vector<128x128xbf16>
    %c2 = arith.constant 2 : index
    %c0_18 = arith.constant 0 : index
    %c0_19 = arith.constant 0 : index
    %26 = vector.load %arg4[%c2, %c0_18, %c0_19] : memref<5x128x128xbf16, #tpu.memory_space<vmem>>, vector<1x128x128xbf16>
    %27 = vector.shape_cast %26 : vector<1x128x128xbf16> to vector<128x128xbf16>
    %cst_20 = arith.constant dense<0.000000e+00> : vector<128x128xf32>
    %28 = tpu.matmul %27, %25, %cst_20 {dimension_numbers = #tpu.dot_dimension_numbers<[1], [0], [0], [1], [0, 0, 1, 1], [], []>} : vector<128x128xbf16>, vector<128x128xbf16>, vector<128x128xf32> -> vector<128x128xf32>
    %c2_21 = arith.constant 2 : index
    %c0_22 = arith.constant 0 : index
    %c0_23 = arith.constant 0 : index
    %29 = vector.load %arg5[%c2_21, %c0_22, %c0_23] : memref<5x128x1xf32, #tpu.memory_space<vmem>>, vector<1x128x1xf32>
    %30 = vector.shape_cast %29 : vector<1x128x1xf32> to vector<128x1xf32>
    %31 = vector.broadcast %30 : vector<128x1xf32> to vector<128x128xf32>
    %32 = arith.addf %28, %31 : vector<128x128xf32>
    %33 = arith.truncf %32 : vector<128x128xf32> to vector<128x128xbf16>
    %34 = math.tanh %33 : vector<128x128xbf16>
    %c3 = arith.constant 3 : index
    %c0_24 = arith.constant 0 : index
    %c0_25 = arith.constant 0 : index
    %35 = vector.load %arg4[%c3, %c0_24, %c0_25] : memref<5x128x128xbf16, #tpu.memory_space<vmem>>, vector<1x128x128xbf16>
    %36 = vector.shape_cast %35 : vector<1x128x128xbf16> to vector<128x128xbf16>
    %cst_26 = arith.constant dense<0.000000e+00> : vector<128x128xf32>
    %37 = tpu.matmul %36, %34, %cst_26 {dimension_numbers = #tpu.dot_dimension_numbers<[1], [0], [0], [1], [0, 0, 1, 1], [], []>} : vector<128x128xbf16>, vector<128x128xbf16>, vector<128x128xf32> -> vector<128x128xf32>
    %c3_27 = arith.constant 3 : index
    %c0_28 = arith.constant 0 : index
    %c0_29 = arith.constant 0 : index
    %38 = vector.load %arg5[%c3_27, %c0_28, %c0_29] : memref<5x128x1xf32, #tpu.memory_space<vmem>>, vector<1x128x1xf32>
    %39 = vector.shape_cast %38 : vector<1x128x1xf32> to vector<128x1xf32>
    %40 = vector.broadcast %39 : vector<128x1xf32> to vector<128x128xf32>
    %41 = arith.addf %37, %40 : vector<128x128xf32>
    %42 = arith.truncf %41 : vector<128x128xf32> to vector<128x128xbf16>
    %43 = math.tanh %42 : vector<128x128xbf16>
    %c4 = arith.constant 4 : index
    %c0_30 = arith.constant 0 : index
    %c0_31 = arith.constant 0 : index
    %44 = vector.load %arg4[%c4, %c0_30, %c0_31] : memref<5x128x128xbf16, #tpu.memory_space<vmem>>, vector<1x128x128xbf16>
    %45 = vector.shape_cast %44 : vector<1x128x128xbf16> to vector<128x128xbf16>
    %cst_32 = arith.constant dense<0.000000e+00> : vector<128x128xf32>
    %46 = tpu.matmul %45, %43, %cst_32 {dimension_numbers = #tpu.dot_dimension_numbers<[1], [0], [0], [1], [0, 0, 1, 1], [], []>} : vector<128x128xbf16>, vector<128x128xbf16>, vector<128x128xf32> -> vector<128x128xf32>
    %c4_33 = arith.constant 4 : index
    %c0_34 = arith.constant 0 : index
    %c0_35 = arith.constant 0 : index
    %47 = vector.load %arg5[%c4_33, %c0_34, %c0_35] : memref<5x128x1xf32, #tpu.memory_space<vmem>>, vector<1x128x1xf32>
    %48 = vector.shape_cast %47 : vector<1x128x1xf32> to vector<128x1xf32>
    %49 = vector.broadcast %48 : vector<128x1xf32> to vector<128x128xf32>
    %50 = arith.addf %46, %49 : vector<128x128xf32>
    %51 = arith.truncf %50 : vector<128x128xf32> to vector<128x128xbf16>
    %52 = math.tanh %51 : vector<128x128xbf16>
    %c0_36 = arith.constant 0 : index
    %c0_37 = arith.constant 0 : index
    %53 = vector.load %arg6[%c0_36, %c0_37] : memref<16x128xbf16, #tpu.memory_space<vmem>>, vector<16x128xbf16>
    %cst_38 = arith.constant dense<0.000000e+00> : vector<16x128xf32>
    %54 = tpu.matmul %53, %52, %cst_38 {dimension_numbers = #tpu.dot_dimension_numbers<[1], [0], [0], [1], [0, 0, 1, 1], [], []>} : vector<16x128xbf16>, vector<128x128xbf16>, vector<16x128xf32> -> vector<16x128xf32>
    %c0_39 = arith.constant 0 : index
    %c0_40 = arith.constant 0 : index
    %55 = vector.load %arg7[%c0_39, %c0_40] : memref<16x1xf32, #tpu.memory_space<vmem>>, vector<16x1xf32>
    %56 = vector.broadcast %55 : vector<16x1xf32> to vector<16x128xf32>
    %57 = arith.addf %54, %56 : vector<16x128xf32>
    %c0_41 = arith.constant 0 : index
    %c0_42 = arith.constant 0 : index
    %58 = vector.load %arg8[%c0_41, %c0_42] : memref<16x128xf32, #tpu.memory_space<vmem>>, vector<16x128xf32>
    tpu.vector_store %arg8[%c0_41, %c0_42], %57 {strides = array<i32>} : memref<16x128xf32, #tpu.memory_space<vmem>>, vector<16x128xf32>,
    return
  }
  func.func @transform_0(%arg0: i32) -> (i32, i32) {
    %c0_i32 = arith.constant 0 : i32
    %c0_i32_0 = arith.constant 0 : i32
    return %c0_i32, %arg0 : i32, i32
  }
  func.func @transform_1(%arg0: i32) -> (i32, i32) {
    %c0_i32 = arith.constant 0 : i32
    %c0_i32_0 = arith.constant 0 : i32
    %c0_i32_1 = arith.constant 0 : i32
    return %c0_i32, %c0_i32_0 : i32, i32
  }
  func.func @transform_2(%arg0: i32) -> (i32, i32) {
    %c0_i32 = arith.constant 0 : i32
    %c0_i32_0 = arith.constant 0 : i32
    %c0_i32_1 = arith.constant 0 : i32
    return %c0_i32, %c0_i32_0 : i32, i32
  }
  func.func @transform_3(%arg0: i32) -> (i32, i32, i32) {
    %c0_i32 = arith.constant 0 : i32
    %c0_i32_0 = arith.constant 0 : i32
    %c0_i32_1 = arith.constant 0 : i32
    %c0_i32_2 = arith.constant 0 : i32
    return %c0_i32, %c0_i32_0, %c0_i32_1 : i32, i32, i32
  }
  func.func @transform_4(%arg0: i32) -> (i32, i32, i32) {
    %c0_i32 = arith.constant 0 : i32
    %c0_i32_0 = arith.constant 0 : i32
    %c0_i32_1 = arith.constant 0 : i32
    %c0_i32_2 = arith.constant 0 : i32
    return %c0_i32, %c0_i32_0, %c0_i32_1 : i32, i32, i32
  }
  func.func @transform_5(%arg0: i32) -> (i32, i32) {
    %c0_i32 = arith.constant 0 : i32
    %c0_i32_0 = arith.constant 0 : i32
    %c0_i32_1 = arith.constant 0 : i32
    return %c0_i32, %c0_i32_0 : i32, i32
  }
  func.func @transform_6(%arg0: i32) -> (i32, i32) {
    %c0_i32 = arith.constant 0 : i32
    %c0_i32_0 = arith.constant 0 : i32
    %c0_i32_1 = arith.constant 0 : i32
    return %c0_i32, %c0_i32_0 : i32, i32
  }
  func.func @transform_7(%arg0: i32) -> (i32, i32) {
    %c0_i32 = arith.constant 0 : i32
    %c0_i32_0 = arith.constant 0 : i32
    return %c0_i32, %arg0 : i32, i32
  }
}

</mosaic_0001>

<bundles_post_ra>
// kernel: tpu_custom_call.1
= control target key start
LH: loop header
LB: loop body
LE: loop exit
PB: predicated region body
PF: predicated region fallthrough
CT: control target
= control target key end

     0   :  { %vm142_vm0 = vcmask 130048   ;;  %v2477_v3 = vmov 0   ;;  %s3031_s0 = inlined_call_operand.vmem [shape: f32[16,128], index: 0, kind: input, shape index: {}]   ;;  %s3032_s1 = inlined_call_operand.vmem [shape: f32[128,16], index: 1, kind: input, shape index: {}]   ;;  %s3033_s2 = inlined_call_operand.vmem [shape: f32[128,1], index: 2, kind: input, shape index: {}]   ;;  %s3034_s3 = inlined_call_operand.vmem [shape: bf16[5,128,128], index: 3, kind: input, shape index: {}]   ;;  %s3035_s4 = inlined_call_operand.vmem [shape: f32[5,128,1], index: 4, kind: input, shape index: {}]   ;;  %s3036_s5 = inlined_call_operand.vmem [shape: bf16[16,128], index: 5, kind: input, shape index: {}]   ;;  %s3037_s6 = inlined_call_operand.vmem [shape: f32[16,1], index: 6, kind: input, shape index: {}]   ;;  %s3038_s7 = inlined_call_operand.hbm [shape: f32[16,128], index: 7, kind: output, shape index: {}]  }
   0x1   :  { %v48_v0 = vld [vmem:[%s3033_s2 + $0x10] sm:$0xff]  ;;  %v46_v1 = vld [vmem:[%s3033_s2] sm:$0xff]  ;;  %2315 = vset.pattern.permute.xlu1 %v2477_v3  ;;  %2314 = vset.pattern.permute.xlu0 %v2477_v3  ;;  %v45_v4 = vld [vmem:[%s3031_s0 + $0x8] sm:$0xff] }
   0x2   :  { %v44_v2 = vld [vmem:[%s3031_s0] sm:$0xff]  ;;  %74 = vperm.xlu1 %2315, %v48_v0   ;;  %64 = vperm.xlu0 %2314, %v46_v1   ;;  %v49_v7 = vld [vmem:[%s3033_s2 + $0x18] sm:$0xff]  ;;  %v47_v8 = vld [vmem:[%s3033_s2 + $0x8] sm:$0xff] }
   0x3   :  { %v2304_v5 = vpack.c.bf16 %v45_v4, %v44_v2  ;;  %v28_v6 = vld [vmem:[%s3032_s1] sm:$0xff]  ;;  %v29_v9 = vld [vmem:[%s3032_s1 + $0x8] sm:$0xff]  ;;  %v30_v10 = vld [vmem:[%s3032_s1 + $0x10] sm:$0xff] }
   0x4   :  { %2100 = vmatprep.mubr.msk.f32.mxu0 %vm142_vm0, %v28_v6  ;;  %v51_v11 = vld [vmem:[%s3033_s2 + $0x28] sm:$0xff]  ;;  %v50_v12 = vld [vmem:[%s3033_s2 + $0x20] sm:$0xff]  ;;  %v31_v13 = vld [vmem:[%s3032_s1 + $0x18] sm:$0xff] }
   0x5   :  { %2305 = vmatprep.subr.bf16.mxu0 %v2304_v5  ;;  %v32_v14 = vld [vmem:[%s3032_s1 + $0x20] sm:$0xff]  ;;  %v53_v15 = vld [vmem:[%s3033_s2 + $0x38] sm:$0xff]  ;;  %v52_v16 = vld [vmem:[%s3033_s2 + $0x30] sm:$0xff] }
   0x6   :  { %2307 = vmatpush3.bf16.msra.mxu0 %v2304_v5  ;;  %79 = vperm.xlu1 %2315, %v49_v7   ;;  %v33_v17 = vld [vmem:[%s3032_s1 + $0x28] sm:$0xff]  ;;  %v34_v18 = vld [vmem:[%s3032_s1 + $0x30] sm:$0xff]  ;;  %v54_v20 = vld [vmem:[%s3033_s2 + $0x40] sm:$0xff] }
   0x7   :  { %69 = vperm.xlu0 %2314, %v47_v8   ;;  %v55_v19 = vld [vmem:[%s3033_s2 + $0x48] sm:$0xff]  ;;  %v35_v21 = vld [vmem:[%s3032_s1 + $0x38] sm:$0xff]  ;;  %v36_v22 = vld [vmem:[%s3032_s1 + $0x40] sm:$0xff] }
   0x8   :  { %v57_v23 = vld [vmem:[%s3033_s2 + $0x58] sm:$0xff]  ;;  %v56_v24 = vld [vmem:[%s3033_s2 + $0x50] sm:$0xff]  ;;  %v37_v25 = vld [vmem:[%s3032_s1 + $0x48] sm:$0xff] }
   0x9   :  { %2101 = vmatmul.mubr.msk.f32.vlgmr.msra.gmra.mrb[0].mxu0 %vm142_vm0, %v29_v9  ;;  %v38_v26 = vld [vmem:[%s3032_s1 + $0x50] sm:$0xff]  ;;  %v59_v27 = vld [vmem:[%s3033_s2 + $0x68] sm:$0xff]  ;;  %v58_v28 = vld [vmem:[%s3033_s2 + $0x60] sm:$0xff] }
   0xa   :  { %2103 = vmatprep.mubr.msk.f32.mxu0 %vm142_vm0, %v30_v10  ;;  %89 = vperm.xlu1 %2315, %v51_v11   ;;  %v39_v29 = vld [vmem:[%s3032_s1 + $0x58] sm:$0xff]  ;;  %v40_v30 = vld [vmem:[%s3032_s1 + $0x60] sm:$0xff]  ;;  %v60_v32 = vld [vmem:[%s3033_s2 + $0x70] sm:$0xff] }
   0xb   :  { %84 = vperm.xlu0 %2314, %v50_v12   ;;  %v61_v31 = vld [vmem:[%s3033_s2 + $0x78] sm:$0xff]  ;;  %v41_v33 = vld [vmem:[%s3032_s1 + $0x68] sm:$0xff]  ;;  %v42_v34 = vld [vmem:[%s3032_s1 + $0x70] sm:$0xff] }
   0xc   :  { %v369_v35 = vld [vmem:[%s3035_s4 + $0x8] sm:$0xff]  ;;  %v368_v36 = vld [vmem:[%s3035_s4] sm:$0xff]  ;;  %v43_v37 = vld [vmem:[%s3032_s1 + $0x78] sm:$0xff] }
   0xd   :  { %2104 = vmatmul.mubr.msk.f32.gmra.mrb[2].mxu0 %vm142_vm0, %v31_v13  ;;  %v371_v38 = vld [vmem:[%s3035_s4 + $0x18] sm:$0xff]  ;;  %v370_v39 = vld [vmem:[%s3035_s4 + $0x10] sm:$0xff]  ;;  %v373_v40 = vld [vmem:[%s3035_s4 + $0x28] sm:$0xff] }
   0xe   :  { %2106 = vmatprep.mubr.msk.f32.mxu0 %vm142_vm0, %v32_v14  ;;  %99 = vperm.xlu1 %2315, %v53_v15   ;;  %v372_v41 = vld [vmem:[%s3035_s4 + $0x20] sm:$0xff]  ;;  %v375_v42 = vld [vmem:[%s3035_s4 + $0x38] sm:$0xff]  ;;  %v374_v43 = vld [vmem:[%s3035_s4 + $0x30] sm:$0xff] }
   0xf   :  { %94 = vperm.xlu0 %2314, %v52_v16   ;;  %v377_v44 = vld [vmem:[%s3035_s4 + $0x48] sm:$0xff]  ;;  %v376_v45 = vld [vmem:[%s3035_s4 + $0x40] sm:$0xff]  ;;  %v379_v46 = vld [vmem:[%s3035_s4 + $0x58] sm:$0xff] }
  0x10   :  { %v378_v47 = vld [vmem:[%s3035_s4 + $0x50] sm:$0xff]  ;;  %v381_v48 = vld [vmem:[%s3035_s4 + $0x68] sm:$0xff]  ;;  %v380_v49 = vld [vmem:[%s3035_s4 + $0x60] sm:$0xff] }
  0x11   :  { %2107 = vmatmul.mubr.msk.f32.gmra.mrb[4].mxu0 %vm142_vm0, %v33_v17  ;;  %v383_v50 = vld [vmem:[%s3035_s4 + $0x78] sm:$0xff]  ;;  %v382_v51 = vld [vmem:[%s3035_s4 + $0x70] sm:$0xff]  ;;  %v1845_v52 = vld [vmem:[%s3035_s4 + $0x88] sm:$0xff] }
  0x12   :  { %2109 = vmatprep.mubr.msk.f32.mxu0 %vm142_vm0, %v34_v18  ;;  %109 = vperm.xlu1 %2315, %v55_v19   ;;  %v1844_v53 = vld [vmem:[%s3035_s4 + $0x80] sm:$0xff] }
  0x13   :  { %104 = vperm.xlu0 %2314, %v54_v20  }
  0x15   :  { %2110 = vmatmul.mubr.msk.f32.gmra.mrb[6].mxu0 %vm142_vm0, %v35_v21 }
  0x16   :  { %2112 = vmatprep.mubr.msk.f32.mxu0 %vm142_vm0, %v36_v22  ;;  %119 = vperm.xlu1 %2315, %v57_v23  }
  0x17   :  { %114 = vperm.xlu0 %2314, %v56_v24  }
  0x19   :  { %2113 = vmatmul.mubr.msk.f32.gmra.mrb[8].mxu0 %vm142_vm0, %v37_v25 }
  0x1a   :  { %2115 = vmatprep.mubr.msk.f32.mxu0 %vm142_vm0, %v38_v26  ;;  %129 = vperm.xlu1 %2315, %v59_v27  }
  0x1b   :  { %124 = vperm.xlu0 %2314, %v58_v28  }
  0x1d   :  { %2116 = vmatmul.mubr.msk.f32.gmra.mrb[10].mxu0 %vm142_vm0, %v39_v29 }
  0x1e   :  { %2118 = vmatprep.mubr.msk.f32.mxu0 %vm142_vm0, %v40_v30  ;;  %139 = vperm.xlu1 %2315, %v61_v31  }
  0x1f   :  { %134 = vperm.xlu0 %2314, %v60_v32  }
  0x21   :  { %2119 = vmatmul.mubr.msk.f32.gmra.mrb[12].mxu0 %vm142_vm0, %v41_v33 }
  0x22   :  { %2121 = vmatprep.mubr.msk.f32.mxu0 %vm142_vm0, %v42_v34  ;;  %391 = vperm.xlu1 %2315, %v369_v35  }
  0x23   :  { %386 = vperm.xlu0 %2314, %v368_v36  }
  0x25   :  { %2122 = vmatmul.mubr.msk.f32.gmra.mrb[14].mxu0 %vm142_vm0, %v43_v37 }
  0x26   :  { %401 = vperm.xlu1 %2315, %v371_v38  }
  0x27   :  { %396 = vperm.xlu0 %2314, %v370_v39  }
  0x2a   :  { %411 = vperm.xlu1 %2315, %v373_v40  }
  0x2b   :  { %406 = vperm.xlu0 %2314, %v372_v41  }
  0x2e   :  { %421 = vperm.xlu1 %2315, %v375_v42  }
  0x2f   :  { %416 = vperm.xlu0 %2314, %v374_v43  }
  0x32   :  { %431 = vperm.xlu1 %2315, %v377_v44  }
  0x33   :  { %426 = vperm.xlu0 %2314, %v376_v45  }
  0x36   :  { %441 = vperm.xlu1 %2315, %v379_v46  }
  0x37   :  { %436 = vperm.xlu0 %2314, %v378_v47  }
  0x3a   :  { %451 = vperm.xlu1 %2315, %v381_v48  }
  0x3b   :  { %446 = vperm.xlu0 %2314, %v380_v49  }
  0x3e   :  { %461 = vperm.xlu1 %2315, %v383_v50  }
  0x3f   :  { %456 = vperm.xlu0 %2314, %v382_v51  }
  0x40   :  { %12 = vsyncpa [#allocation3], 0  ;;  %v1847_v54 = vld [vmem:[%s3035_s4 + $0x98] sm:$0xff]  ;;  %v1846_v55 = vld [vmem:[%s3035_s4 + $0x90] sm:$0xff]  ;;  %vm2479_vm1 = vmmov 0   ;;  %s2480_s24 = smov [#allocation2]  }
  0x41   :  { %v1849_v56 = vld [vmem:[%s3035_s4 + $0xa8] sm:$0xff]  ;;  %v1848_v57 = vld [vmem:[%s3035_s4 + $0xa0] sm:$0xff]  ;;  %v1851_v58 = vld [vmem:[%s3035_s4 + $0xb8] sm:$0xff]  ;;  %s1793_s25 = sshll.u32 %s2480_s24, 4  ;;  %s1794_s25 = int_to_ptr.vmem [resolvable:$true] %s1793_s25 }
  0x42   :  { %666 = vperm.xlu1 %2315, %v1845_v52   ;;  %v1850_v59 = vld [vmem:[%s3035_s4 + $0xb0] sm:$0xff]  ;;  %v1853_v60 = vld [vmem:[%s3035_s4 + $0xc8] sm:$0xff]  ;;  %v1852_v61 = vld [vmem:[%s3035_s4 + $0xc0] sm:$0xff]  ;;  %s2453_s26 = scalar_lea.vmem %s1794_s25, 256  ;;  %p2458_p1 = scmp.lt.s32.totalorder %s1794_s25, %s1794_s25 }
  0x43   :  { %661 = vperm.xlu0 %2314, %v1844_v53   ;;  %v1855_v62 = vld [vmem:[%s3035_s4 + $0xd8] sm:$0xff]  ;;  %v1854_v63 = vld [vmem:[%s3035_s4 + $0xd0] sm:$0xff]  ;;  %v1857_v0 = vld [vmem:[%s3035_s4 + $0xe8] sm:$0xff]  ;;  %p2454_p0 = scmp.ne.s32.totalorder %s1794_s25, %s2453_s26  ;;  %p2459_p2 = scmp.lt.s32.totalorder %s2453_s26, %s2453_s26 }
  0x44   :  { %v1856_v1 = vld [vmem:[%s3035_s4 + $0xe0] sm:$0xff]  ;;  %v1859_v2 = vld [vmem:[%s3035_s4 + $0xf8] sm:$0xff]  ;;  %v1858_v3 = vld [vmem:[%s3035_s4 + $0xf0] sm:$0xff] }
  0x45   :  { %v1885_v4 = vld [vmem:[%s3035_s4 + $0x108] sm:$0xff]  ;;  %v1884_v5 = vld [vmem:[%s3035_s4 + $0x100] sm:$0xff]  ;;  %v1887_v6 = vld [vmem:[%s3035_s4 + $0x118] sm:$0xff]  ;;  %p2460_p3 = por %p2459_p2, %p2458_p1 }
  0x46   :  { %676 = vperm.xlu1 %2315, %v1847_v54   ;;  %v1886_v7 = vld [vmem:[%s3035_s4 + $0x110] sm:$0xff]  ;;  %v1889_v8 = vld [vmem:[%s3035_s4 + $0x128] sm:$0xff]  ;;  %v1888_v9 = vld [vmem:[%s3035_s4 + $0x120] sm:$0xff] }
  0x47   :  { %671 = vperm.xlu0 %2314, %v1846_v55   ;;  %v1891_v10 = vld [vmem:[%s3035_s4 + $0x138] sm:$0xff]  ;;  %v1890_v11 = vld [vmem:[%s3035_s4 + $0x130] sm:$0xff]  ;;  %v1893_v12 = vld [vmem:[%s3035_s4 + $0x148] sm:$0xff]  ;;  %p2461_p4 = pnand %p2460_p3, %p2454_p0 }
  0x48   :  { %v1892_v13 = vld [vmem:[%s3035_s4 + $0x140] sm:$0xff]  ;;  %v1895_v14 = vld [vmem:[%s3035_s4 + $0x158] sm:$0xff]  ;;  %v1894_v15 = vld [vmem:[%s3035_s4 + $0x150] sm:$0xff] }
  0x49   :  { %v1897_v16 = vld [vmem:[%s3035_s4 + $0x168] sm:$0xff]  ;;  %v1896_v17 = vld [vmem:[%s3035_s4 + $0x160] sm:$0xff]  ;;  %v1899_v18 = vld [vmem:[%s3035_s4 + $0x178] sm:$0xff] }
  0x4a   :  { %686 = vperm.xlu1 %2315, %v1849_v56   ;;  %v1898_v19 = vld [vmem:[%s3035_s4 + $0x170] sm:$0xff]  ;;  %v1925_v20 = vld [vmem:[%s3035_s4 + $0x188] sm:$0xff]  ;;  %v1924_v21 = vld [vmem:[%s3035_s4 + $0x180] sm:$0xff] }
  0x4b   :  { %681 = vperm.xlu0 %2314, %v1848_v57   ;;  %v1927_v22 = vld [vmem:[%s3035_s4 + $0x198] sm:$0xff]  ;;  %v1926_v23 = vld [vmem:[%s3035_s4 + $0x190] sm:$0xff]  ;;  %v1929_v24 = vld [vmem:[%s3035_s4 + $0x1a8] sm:$0xff] }
  0x4c   :  { %v1928_v25 = vld [vmem:[%s3035_s4 + $0x1a0] sm:$0xff]  ;;  %v1931_v27 = vld [vmem:[%s3035_s4 + $0x1b8] sm:$0xff]  ;;  %v1930_v28 = vld [vmem:[%s3035_s4 + $0x1b0] sm:$0xff] }
  0x4d   :  { %v2316_v26 = vld [vmem:[%s3034_s3] sm:$0xff]   ;;  %v1933_v29 = vld [vmem:[%s3035_s4 + $0x1c8] sm:$0xff]  ;;  %v1935_v31 = vld [vmem:[%s3035_s4 + $0x1d8] sm:$0xff] }
  0x4e   :  { %696 = vperm.xlu1 %2315, %v1851_v58   ;;  %2140 = vmatprep.mubr.bf16.mxu1 %v2316_v26  ;;  %v1932_v30 = vld [vmem:[%s3035_s4 + $0x1c0] sm:$0xff]  ;;  %v1934_v32 = vld [vmem:[%s3035_s4 + $0x1d0] sm:$0xff]  ;;  %v1937_v33 = vld [vmem:[%s3035_s4 + $0x1e8] sm:$0xff] }
  0x4f   :  { %691 = vperm.xlu0 %2314, %v1850_v59   ;;  %v1936_v34 = vld [vmem:[%s3035_s4 + $0x1e0] sm:$0xff]  ;;  %v1939_v35 = vld [vmem:[%s3035_s4 + $0x1f8] sm:$0xff]  ;;  %v1938_v36 = vld [vmem:[%s3035_s4 + $0x1f0] sm:$0xff] }
  0x50   :  { %v1965_v37 = vld [vmem:[%s3035_s4 + $0x208] sm:$0xff]  ;;  %v1964_v38 = vld [vmem:[%s3035_s4 + $0x200] sm:$0xff]  ;;  %v1967_v39 = vld [vmem:[%s3035_s4 + $0x218] sm:$0xff] }
  0x51   :  { %v1966_v40 = vld [vmem:[%s3035_s4 + $0x210] sm:$0xff]  ;;  %v1969_v41 = vld [vmem:[%s3035_s4 + $0x228] sm:$0xff]  ;;  %v1968_v42 = vld [vmem:[%s3035_s4 + $0x220] sm:$0xff] }
  0x52   :  { %706 = vperm.xlu1 %2315, %v1853_v60   ;;  %v1971_v43 = vld [vmem:[%s3035_s4 + $0x238] sm:$0xff]  ;;  %v1970_v44 = vld [vmem:[%s3035_s4 + $0x230] sm:$0xff]  ;;  %v1973_v45 = vld [vmem:[%s3035_s4 + $0x248] sm:$0xff] }
  0x53   :  { %701 = vperm.xlu0 %2314, %v1852_v61   ;;  %v1972_v46 = vld [vmem:[%s3035_s4 + $0x240] sm:$0xff]  ;;  %v1975_v47 = vld [vmem:[%s3035_s4 + $0x258] sm:$0xff]  ;;  %v1974_v48 = vld [vmem:[%s3035_s4 + $0x250] sm:$0xff] }
  0x54   :  { %v1977_v49 = vld [vmem:[%s3035_s4 + $0x268] sm:$0xff]  ;;  %v1976_v50 = vld [vmem:[%s3035_s4 + $0x260] sm:$0xff]  ;;  %v1979_v51 = vld [vmem:[%s3035_s4 + $0x278] sm:$0xff] }
  0x55   :  { %v1978_v52 = vld [vmem:[%s3035_s4 + $0x270] sm:$0xff]  ;;  %v1728_v53 = vld [vmem:[%s3037_s6 + $0x8] sm:$0xff]  ;;  %v1727_v54 = vld [vmem:[%s3037_s6] sm:$0xff] }
  0x56   :  { %716 = vperm.xlu1 %2315, %v1855_v62  }
  0x57   :  { %711 = vperm.xlu0 %2314, %v1854_v63  }
  0x5a   :  { %726 = vperm.xlu1 %2315, %v1857_v0  }
  0x5b   :  { %721 = vperm.xlu0 %2314, %v1856_v1  }
  0x5e   :  { %736 = vperm.xlu1 %2315, %v1859_v2  }
  0x5f   :  { %731 = vperm.xlu0 %2314, %v1858_v3  }
  0x62   :  { %941 = vperm.xlu1 %2315, %v1885_v4  }
  0x63   :  { %936 = vperm.xlu0 %2314, %v1884_v5  }
  0x66   :  { %951 = vperm.xlu1 %2315, %v1887_v6  }
  0x67   :  { %946 = vperm.xlu0 %2314, %v1886_v7  }
  0x6a   :  { %961 = vperm.xlu1 %2315, %v1889_v8  }
  0x6b   :  { %956 = vperm.xlu0 %2314, %v1888_v9  }
  0x6e   :  { %971 = vperm.xlu1 %2315, %v1891_v10  }
  0x6f   :  { %966 = vperm.xlu0 %2314, %v1890_v11  }
  0x72   :  { %981 = vperm.xlu1 %2315, %v1893_v12  }
  0x73   :  { %976 = vperm.xlu0 %2314, %v1892_v13  }
  0x76   :  { %991 = vperm.xlu1 %2315, %v1895_v14  }
  0x77   :  { %986 = vperm.xlu0 %2314, %v1894_v15  }
  0x7a   :  { %1001 = vperm.xlu1 %2315, %v1897_v16  }
  0x7b   :  { %996 = vperm.xlu0 %2314, %v1896_v17  }
  0x7e   :  { %1011 = vperm.xlu1 %2315, %v1899_v18  }
  0x7f   :  { %1006 = vperm.xlu0 %2314, %v1898_v19  }
  0x81   :  { %v75_v55 = vpop.permute.xlu1 %74  ;;  %v65_v56 = vpop.permute.xlu0 %64 }
  0x82   :  { %1216 = vperm.xlu1 %2315, %v1925_v20  }
  0x83   :  { %1211 = vperm.xlu0 %2314, %v1924_v21  }
  0x85   :  { %v80_v57 = vpop.permute.xlu1 %79 }
  0x86   :  { %1226 = vperm.xlu1 %2315, %v1927_v22   ;;  %v70_v58 = vpop.permute.xlu0 %69 }
  0x87   :  { %1221 = vperm.xlu0 %2314, %v1926_v23  }
  0x89   :  { %v90_v59 = vpop.permute.xlu1 %89 }
  0x8a   :  { %1236 = vperm.xlu1 %2315, %v1929_v24   ;;  %v85_v60 = vpop.permute.xlu0 %84 }
  0x8b   :  { %1231 = vperm.xlu0 %2314, %v1928_v25  }
  0x8d   :  { %v100_v1 = vpop.permute.xlu1 %99 }
  0x8e   :  { %1246 = vperm.xlu1 %2315, %v1931_v27   ;;  %v95_v4 = vpop.permute.xlu0 %94 }
  0x8f   :  { %1241 = vperm.xlu0 %2314, %v1930_v28  }
  0x91   :  { %v110_v12 = vpop.permute.xlu1 %109 }
  0x92   :  { %1256 = vperm.xlu1 %2315, %v1933_v29   ;;  %v105_v14 = vpop.permute.xlu0 %104 }
  0x93   :  { %1251 = vperm.xlu0 %2314, %v1932_v30  }
  0x95   :  { %v120_v20 = vpop.permute.xlu1 %119 }
  0x96   :  { %1266 = vperm.xlu1 %2315, %v1935_v31   ;;  %v115_v24 = vpop.permute.xlu0 %114 }
  0x97   :  { %1261 = vperm.xlu0 %2314, %v1934_v32  }
  0x9a   :  { %1276 = vperm.xlu1 %2315, %v1937_v33   ;;  %v130_v33 = vpop.permute.xlu1 %129 }
  0x9b   :  { %1271 = vperm.xlu0 %2314, %v1936_v34  }
  0x9e   :  { %1286 = vperm.xlu1 %2315, %v1939_v35   ;;  %v125_v35 = vpop.permute.xlu0 %124 }
  0x9f   :  { %1281 = vperm.xlu0 %2314, %v1938_v36  }
  0xa2   :  { %1491 = vperm.xlu1 %2315, %v1965_v37  }
  0xa3   :  { %1486 = vperm.xlu0 %2314, %v1964_v38  }
  0xa6   :  { %1501 = vperm.xlu1 %2315, %v1967_v39  }
  0xa7   :  { %1496 = vperm.xlu0 %2314, %v1966_v40  }
  0xaa   :  { %1511 = vperm.xlu1 %2315, %v1969_v41  }
  0xab   :  { %1506 = vperm.xlu0 %2314, %v1968_v42   ;;  %v140_v42 = vpop.permute.xlu1 %139 }
  0xae   :  { %1521 = vperm.xlu1 %2315, %v1971_v43  }
  0xaf   :  { %1516 = vperm.xlu0 %2314, %v1970_v44  }
  0xb2   :  { %1531 = vperm.xlu1 %2315, %v1973_v45  }
  0xb3   :  { %1526 = vperm.xlu0 %2314, %v1972_v46   ;;  %v135_v46 = vpop.permute.xlu0 %134 }
  0xb6   :  { %1541 = vperm.xlu1 %2315, %v1975_v47  }
  0xb7   :  { %1536 = vperm.xlu0 %2314, %v1974_v48  }
  0xba   :  { %1551 = vperm.xlu1 %2315, %v1977_v49  }
  0xbb   :  { %1546 = vperm.xlu0 %2314, %v1976_v50  }
  0xbe   :  { %1561 = vperm.xlu1 %2315, %v1979_v51  }
  0xbf   :  { %1556 = vperm.xlu0 %2314, %v1978_v52  }
  0xc2   :  { %1736 = vperm.xlu1 %2315, %v1728_v53  }
  0xc3   :  { %1731 = vperm.xlu0 %2314, %v1727_v54  }
  0xdc   :  { %v2102_v61 = vpop.f32.mrb[0].mxu0 }
  0xdd   :  { %v263_v62 = vadd.f32 %v2102_v61, %v70_v58  ;;  %v257_v63 = vpop.f32.mrb[1].mxu0  ;;  %v2320_v58 = vld [vmem:[%s3034_s3 + $0x20] sm:$0xff]   ;;  %v2323_v61 = vld [vmem:[%s3034_s3 + $0x38] sm:$0xff]  }
  0xde   :  { %v258_v0 = vadd.f32 %v257_v63, %v65_v56  ;;  %v2318_v56 = vld [vmem:[%s3034_s3 + $0x10] sm:$0xff]   ;;  %v392_v63 = vpop.permute.xlu1 %391 }
  0xe0   :  { %v336_v2 = vpack.c.bf16 %v263_v62, %v258_v0  ;;  %v2105_v3 = vpop.f32.mrb[2].mxu0  ;;  %v2324_v62 = vld [vmem:[%s3034_s3 + $0x40] sm:$0xff]   ;;  %v387_v0 = vpop.permute.xlu0 %386 }
  0xe1   :  { %v273_v5 = vadd.f32 %v2105_v3, %v80_v57  ;;  %v267_v6 = vpop.f32.mrb[3].mxu0  ;;  %v2319_v57 = vld [vmem:[%s3034_s3 + $0x18] sm:$0xff]   ;;  %2172 = vmatprep.mubr.bf16.mxu0 %v2324_v62 }
  0xe2   :  { %2357 = vtanh.bf16 %v336_v2  ;;  %v268_v7 = vadd.f32 %v267_v6, %v75_v55  ;;  %v2317_v55 = vld [vmem:[%s3034_s3 + $0x8] sm:$0xff]  }
  0xe4   :  { %v337_v8 = vpack.c.bf16 %v273_v5, %v268_v7  ;;  %v2108_v9 = vpop.f32.mrb[4].mxu0  ;;  %v397_v2 = vpop.permute.xlu0 %396 }
  0xe5   :  { %v283_v10 = vadd.f32 %v2108_v9, %v90_v59  ;;  %v277_v11 = vpop.f32.mrb[5].mxu0  ;;  %v2321_v59 = vld [vmem:[%s3034_s3 + $0x28] sm:$0xff]  }
  0xe6   :  { %2359 = vtanh.bf16 %v337_v8  ;;  %v278_v13 = vadd.f32 %v277_v11, %v85_v60  ;;  %v2322_v60 = vld [vmem:[%s3034_s3 + $0x30] sm:$0xff]  }
  0xe8   :  { %v338_v15 = vpack.c.bf16 %v283_v10, %v278_v13  ;;  %v2111_v16 = vpop.f32.mrb[6].mxu0 }
  0xe9   :  { %v293_v17 = vadd.f32 %v2111_v16, %v100_v1  ;;  %v287_v18 = vpop.f32.mrb[7].mxu0  ;;  %v402_v1 = vpop.permute.xlu1 %401 }
  0xea   :  { %2361 = vtanh.bf16 %v338_v15  ;;  %v288_v19 = vadd.f32 %v287_v18, %v95_v4  ;;  %v407_v4 = vpop.permute.xlu0 %406 }
  0xec   :  { %v339_v21 = vpack.c.bf16 %v293_v17, %v288_v19  ;;  %v2114_v22 = vpop.f32.mrb[8].mxu0 }
  0xed   :  { %v2358_v23 = vpop.eup %2357  ;;  %v303_v25 = vadd.f32 %v2114_v22, %v110_v12  ;;  %v297_v26 = vpop.f32.mrb[9].mxu0 }
  0xee   :  { %2363 = vtanh.bf16 %v339_v21  ;;  %v298_v27 = vadd.f32 %v297_v26, %v105_v14  ;;  %2124 = vmatprep.subr.bf16.mxu1 %v2358_v23  ;;  %v412_v3 = vpop.permute.xlu1 %411  ;;  %v417_v8 = vpop.permute.xlu0 %416 }
  0xef   :  { %2125 = vmatpush3.bf16.msra.mxu1 %v2358_v23 }
  0xf0   :  { %v340_v28 = vpack.c.bf16 %v303_v25, %v298_v27  ;;  %v2117_v29 = vpop.f32.mrb[10].mxu0 }
  0xf1   :  { %v2360_v30 = vpop.eup %2359  ;;  %v313_v31 = vadd.f32 %v2117_v29, %v120_v20  ;;  %v307_v32 = vpop.f32.mrb[11].mxu0 }
  0xf2   :  { %2365 = vtanh.bf16 %v340_v28  ;;  %v308_v34 = vadd.f32 %v307_v32, %v115_v24  ;;  %2126 = vmatprep.subr.bf16.mxu1 %v2360_v30  ;;  %v422_v6 = vpop.permute.xlu1 %421  ;;  %v427_v18 = vpop.permute.xlu0 %426 }
  0xf3   :  { %2127 = vmatpush3.bf16.msra.mxu1 %v2360_v30 }
  0xf4   :  { %v341_v36 = vpack.c.bf16 %v313_v31, %v308_v34  ;;  %v2120_v37 = vpop.f32.mrb[12].mxu0 }
  0xf5   :  { %v2362_v38 = vpop.eup %2361  ;;  %v323_v39 = vadd.f32 %v2120_v37, %v130_v33  ;;  %v317_v40 = vpop.f32.mrb[13].mxu0 }
  0xf6   :  { %2367 = vtanh.bf16 %v341_v36  ;;  %v318_v41 = vadd.f32 %v317_v40, %v125_v35  ;;  %2128 = vmatprep.subr.bf16.mxu1 %v2362_v38  ;;  %v432_v17 = vpop.permute.xlu1 %431  ;;  %v437_v29 = vpop.permute.xlu0 %436 }
  0xf7   :  { %2129 = vmatpush3.bf16.msra.mxu1 %v2362_v38 }
  0xf8   :  { %v342_v43 = vpack.c.bf16 %v323_v39, %v318_v41  ;;  %v2123_v44 = vpop.f32.mrb[14].mxu0 }
  0xf9   :  { %v2364_v45 = vpop.eup %2363  ;;  %v333_v47 = vadd.f32 %v2123_v44, %v140_v42  ;;  %v327_v48 = vpop.f32.mrb[15].mxu0 }
  0xfa   :  { %2369 = vtanh.bf16 %v342_v43  ;;  %v328_v49 = vadd.f32 %v327_v48, %v135_v46  ;;  %2130 = vmatprep.subr.bf16.mxu1 %v2364_v45  ;;  %v442_v27 = vpop.permute.xlu1 %441  ;;  %v447_v39 = vpop.permute.xlu0 %446 }
  0xfb   :  { %2131 = vmatpush3.bf16.msra.mxu1 %v2364_v45 }
  0xfc   :  { %v343_v50 = vpack.c.bf16 %v333_v47, %v328_v49 }
  0xfd   :  { %v2366_v51 = vpop.eup %2365 }
  0xfe   :  { %2371 = vtanh.bf16 %v343_v50  ;;  %2132 = vmatprep.subr.bf16.mxu1 %v2366_v51  ;;  %v452_v35 = vpop.permute.xlu1 %451  ;;  %v457_v48 = vpop.permute.xlu0 %456 }
  0xff   :  { %2133 = vmatpush3.bf16.msra.mxu1 %v2366_v51 }
 0x101   :  { %v2368_v52 = vpop.eup %2367 }
 0x102   :  { %2134 = vmatprep.subr.bf16.mxu1 %v2368_v52  ;;  %v462_v46 = vpop.permute.xlu1 %461 }
 0x103   :  { %2135 = vmatpush3.bf16.msra.mxu1 %v2368_v52 }
 0x105   :  { %v2370_v53 = vpop.eup %2369 }
 0x106   :  { %2136 = vmatprep.subr.bf16.mxu1 %v2370_v53 }
 0x107   :  { %2137 = vmatpush3.bf16.msra.mxu1 %v2370_v53 }
 0x109   :  { %v2372_v54 = vpop.eup %2371 }
 0x10a   :  { %2138 = vmatprep.subr.bf16.mxu1 %v2372_v54 }
 0x10b   :  { %2139 = vmatpush3.bf16.msra.mxu1 %v2372_v54 }
 0x10e   :  { %2141 = vmatmul.mubr.bf16.vlgmr.msra.gmra.mrb[0].mxu1 %v2317_v55 }
 0x10f   :  { %2144 = vmatprep.mubr.bf16.mxu1 %v2318_v56 }
 0x116   :  { %2145 = vmatmul.mubr.bf16.gmra.mrb[4].mxu1 %v2319_v57 }
 0x117   :  { %2148 = vmatprep.mubr.bf16.mxu1 %v2320_v58 }
 0x11e   :  { %2149 = vmatmul.mubr.bf16.gmra.mrb[8].mxu1 %v2321_v59 }
 0x11f   :  { %2152 = vmatprep.mubr.bf16.mxu1 %v2322_v60 }
 0x126   :  { %2153 = vmatmul.mubr.bf16.gmra.mrb[12].mxu1 %v2323_v61 }
 0x1e1   :  { %v2142_v5 = vpop.f32.mrb[0].mxu1 }
 0x1e2   :  { %v546_v7 = vpop.f32.mrb[1].mxu1  ;;  %v555_v10 = vadd.f32 %v2142_v5, %v397_v2  ;;  %v2328_v2 = vld [vmem:[%s3034_s3 + $0x60] sm:$0xff]   ;;  %v2331_v5 = vld [vmem:[%s3034_s3 + $0x78] sm:$0xff]  }
 0x1e3   :  { %v2143_v9 = vpop.f32.mrb[2].mxu1  ;;  %v547_v13 = vadd.f32 %v546_v7, %v387_v0  ;;  %v2326_v0 = vld [vmem:[%s3034_s3 + $0x50] sm:$0xff]   ;;  %v667_v7 = vpop.permute.xlu1 %666 }
 0x1e4   :  { %v558_v11 = vadd.f32 %v2143_v9, %v402_v1  ;;  %v549_v12 = vpop.f32.mrb[3].mxu1  ;;  %v2327_v1 = vld [vmem:[%s3034_s3 + $0x58] sm:$0xff]  }
 0x1e5   :  { %v550_v14 = vadd.f32 %v549_v12, %v392_v63  ;;  %v2325_v63 = vld [vmem:[%s3034_s3 + $0x48] sm:$0xff]  }
 0x1e6   :  { %v610_v15 = vpack.c.bf16 %v558_v11, %v555_v10 }
 0x1e7   :  { %v609_v16 = vpack.c.bf16 %v550_v14, %v547_v13  ;;  %v677_v9 = vpop.permute.xlu1 %676 }
 0x1e9   :  { %2373 = vtanh.bf16 %v609_v16  ;;  %v2146_v19 = vpop.f32.mrb[4].mxu1 }
 0x1ea   :  { %v562_v20 = vpop.f32.mrb[5].mxu1  ;;  %2375 = vtanh.bf16 %v610_v15  ;;  %v571_v22 = vadd.f32 %v2146_v19, %v417_v8  ;;  %v662_v8 = vpop.permute.xlu0 %661 }
 0x1eb   :  { %v2147_v21 = vpop.f32.mrb[6].mxu1  ;;  %v563_v25 = vadd.f32 %v562_v20, %v407_v4  ;;  %v2330_v4 = vld [vmem:[%s3034_s3 + $0x70] sm:$0xff]   ;;  %v687_v11 = vpop.permute.xlu1 %686 }
 0x1ec   :  { %v574_v23 = vadd.f32 %v2147_v21, %v422_v6  ;;  %v565_v24 = vpop.f32.mrb[7].mxu1  ;;  %v2332_v6 = vld [vmem:[%s3034_s3 + $0x80] sm:$0xff]  }
 0x1ed   :  { %v566_v26 = vadd.f32 %v565_v24, %v412_v3  ;;  %v2329_v3 = vld [vmem:[%s3034_s3 + $0x68] sm:$0xff]   ;;  %2204 = vmatprep.mubr.bf16.mxu1 %v2332_v6 }
 0x1ee   :  { %v612_v28 = vpack.c.bf16 %v574_v23, %v571_v22  ;;  %v672_v10 = vpop.permute.xlu0 %671 }
 0x1ef   :  { %v611_v30 = vpack.c.bf16 %v566_v26, %v563_v25  ;;  %v697_v14 = vpop.permute.xlu1 %696 }
 0x1f1   :  { %2377 = vtanh.bf16 %v611_v30  ;;  %v2150_v31 = vpop.f32.mrb[8].mxu1 }
 0x1f2   :  { %v578_v32 = vpop.f32.mrb[9].mxu1  ;;  %2379 = vtanh.bf16 %v612_v28  ;;  %v587_v36 = vadd.f32 %v2150_v31, %v437_v29  ;;  %v682_v12 = vpop.permute.xlu0 %681 }
 0x1f3   :  { %v2151_v33 = vpop.f32.mrb[10].mxu1  ;;  %v579_v40 = vadd.f32 %v578_v32, %v427_v18  ;;  %v707_v25 = vpop.permute.xlu1 %706 }
 0x1f4   :  { %v2374_v34 = vpop.eup %2373  ;;  %v590_v37 = vadd.f32 %v2151_v33, %v442_v27  ;;  %v581_v38 = vpop.f32.mrb[11].mxu1 }
 0x1f5   :  { %v582_v41 = vadd.f32 %v581_v38, %v432_v17  ;;  %2156 = vmatprep.subr.bf16.mxu0 %v2374_v34  ;;  %v2376_v42 = vpop.eup %2375 }
 0x1f6   :  { %v614_v43 = vpack.c.bf16 %v590_v37, %v587_v36  ;;  %2157 = vmatpush3.bf16.msra.mxu0 %v2374_v34  ;;  %v692_v16 = vpop.permute.xlu0 %691 }
 0x1f7   :  { %v613_v44 = vpack.c.bf16 %v582_v41, %v579_v40  ;;  %2158 = vmatprep.subr.bf16.mxu0 %v2376_v42 }
 0x1f9   :  { %2381 = vtanh.bf16 %v613_v44  ;;  %v2154_v45 = vpop.f32.mrb[12].mxu1 }
 0x1fa   :  { %v594_v47 = vpop.f32.mrb[13].mxu1  ;;  %2159 = vmatpush3.bf16.msra.mxu0 %v2376_v42  ;;  %2383 = vtanh.bf16 %v614_v43  ;;  %v603_v51 = vadd.f32 %v2154_v45, %v457_v48  ;;  %v702_v26 = vpop.permute.xlu0 %701 }
 0x1fb   :  { %v2155_v49 = vpop.f32.mrb[14].mxu1  ;;  %v595_v54 = vadd.f32 %v594_v47, %v447_v39 }
 0x1fc   :  { %v2378_v50 = vpop.eup %2377  ;;  %v606_v52 = vadd.f32 %v2155_v49, %v462_v46  ;;  %v597_v53 = vpop.f32.mrb[15].mxu1 }
 0x1fd   :  { %v598_v55 = vadd.f32 %v597_v53, %v452_v35  ;;  %2160 = vmatprep.subr.bf16.mxu0 %v2378_v50  ;;  %v2380_v56 = vpop.eup %2379  ;;  %v717_v35 = vpop.permute.xlu1 %716 }
 0x1fe   :  { %v616_v57 = vpack.c.bf16 %v606_v52, %v603_v51  ;;  %2161 = vmatpush3.bf16.msra.mxu0 %v2378_v50  ;;  %v712_v37 = vpop.permute.xlu0 %711 }
 0x1ff   :  { %v615_v58 = vpack.c.bf16 %v598_v55, %v595_v54  ;;  %2162 = vmatprep.subr.bf16.mxu0 %v2380_v56 }
 0x201   :  { %2385 = vtanh.bf16 %v615_v58  ;;  %v727_v43 = vpop.permute.xlu1 %726 }
 0x202   :  { %2163 = vmatpush3.bf16.msra.mxu0 %v2380_v56  ;;  %2387 = vtanh.bf16 %v616_v57  ;;  %v722_v47 = vpop.permute.xlu0 %721 }
 0x204   :  { %v2382_v59 = vpop.eup %2381 }
 0x205   :  { %2164 = vmatprep.subr.bf16.mxu0 %v2382_v59  ;;  %v2384_v60 = vpop.eup %2383  ;;  %v737_v54 = vpop.permute.xlu1 %736 }
 0x206   :  { %2165 = vmatpush3.bf16.msra.mxu0 %v2382_v59  ;;  %v732_v56 = vpop.permute.xlu0 %731 }
 0x207   :  { %2166 = vmatprep.subr.bf16.mxu0 %v2384_v60 }
 0x20a   :  { %2167 = vmatpush3.bf16.msra.mxu0 %v2384_v60 }
 0x20c   :  { %v2386_v61 = vpop.eup %2385 }
 0x20d   :  { %2168 = vmatprep.subr.bf16.mxu0 %v2386_v61  ;;  %v2388_v62 = vpop.eup %2387 }
 0x20e   :  { %2169 = vmatpush3.bf16.msra.mxu0 %v2386_v61 }
 0x20f   :  { %2170 = vmatprep.subr.bf16.mxu0 %v2388_v62 }
 0x212   :  { %2171 = vmatpush3.bf16.msra.mxu0 %v2388_v62 }
 0x215   :  { %2173 = vmatmul.mubr.bf16.vlgmr.msra.gmra.mrb[16].mxu0 %v2325_v63 }
 0x216   :  { %2176 = vmatprep.mubr.bf16.mxu0 %v2326_v0 }
 0x21d   :  { %2177 = vmatmul.mubr.bf16.gmra.mrb[20].mxu0 %v2327_v1 }
 0x21e   :  { %2180 = vmatprep.mubr.bf16.mxu0 %v2328_v2 }
 0x225   :  { %2181 = vmatmul.mubr.bf16.gmra.mrb[24].mxu0 %v2329_v3 }
 0x226   :  { %2184 = vmatprep.mubr.bf16.mxu0 %v2330_v4 }
 0x22d   :  { %2185 = vmatmul.mubr.bf16.gmra.mrb[28].mxu0 %v2331_v5 }
 0x2e8   :  { %v2174_v13 = vpop.f32.mrb[16].mxu0 }
 0x2e9   :  { %v821_v15 = vpop.f32.mrb[17].mxu0  ;;  %v830_v18 = vadd.f32 %v2174_v13, %v672_v10  ;;  %v2336_v10 = vld [vmem:[%s3034_s3 + $0xa0] sm:$0xff]   ;;  %v2339_v13 = vld [vmem:[%s3034_s3 + $0xb8] sm:$0xff]  }
 0x2ea   :  { %v2175_v17 = vpop.f32.mrb[18].mxu0  ;;  %v822_v21 = vadd.f32 %v821_v15, %v662_v8  ;;  %v2334_v8 = vld [vmem:[%s3034_s3 + $0x90] sm:$0xff]   ;;  %v942_v15 = vpop.permute.xlu1 %941 }
 0x2eb   :  { %v833_v19 = vadd.f32 %v2175_v17, %v677_v9  ;;  %v824_v20 = vpop.f32.mrb[19].mxu0  ;;  %v2335_v9 = vld [vmem:[%s3034_s3 + $0x98] sm:$0xff]  }
 0x2ec   :  { %v825_v22 = vadd.f32 %v824_v20, %v667_v7  ;;  %v2333_v7 = vld [vmem:[%s3034_s3 + $0x88] sm:$0xff]  }
 0x2ed   :  { %v885_v23 = vpack.c.bf16 %v833_v19, %v830_v18 }
 0x2ee   :  { %v884_v24 = vpack.c.bf16 %v825_v22, %v822_v21  ;;  %v952_v17 = vpop.permute.xlu1 %951 }
 0x2f0   :  { %2389 = vtanh.bf16 %v884_v24  ;;  %v2178_v27 = vpop.f32.mrb[20].mxu0 }
 0x2f1   :  { %v837_v28 = vpop.f32.mrb[21].mxu0  ;;  %2391 = vtanh.bf16 %v885_v23  ;;  %v846_v30 = vadd.f32 %v2178_v27, %v692_v16  ;;  %v937_v16 = vpop.permute.xlu0 %936 }
 0x2f2   :  { %v2179_v29 = vpop.f32.mrb[22].mxu0  ;;  %v838_v33 = vadd.f32 %v837_v28, %v682_v12  ;;  %v2338_v12 = vld [vmem:[%s3034_s3 + $0xb0] sm:$0xff]   ;;  %v962_v19 = vpop.permute.xlu1 %961 }
 0x2f3   :  { %v849_v31 = vadd.f32 %v2179_v29, %v697_v14  ;;  %v840_v32 = vpop.f32.mrb[23].mxu0  ;;  %v2340_v14 = vld [vmem:[%s3034_s3 + $0xc0] sm:$0xff]  }
 0x2f4   :  { %v841_v34 = vadd.f32 %v840_v32, %v687_v11  ;;  %v2337_v11 = vld [vmem:[%s3034_s3 + $0xa8] sm:$0xff]   ;;  %2236 = vmatprep.mubr.bf16.mxu0 %v2340_v14 }
 0x2f5   :  { %v887_v36 = vpack.c.bf16 %v849_v31, %v846_v30  ;;  %v947_v18 = vpop.permute.xlu0 %946 }
 0x2f6   :  { %v886_v38 = vpack.c.bf16 %v841_v34, %v838_v33  ;;  %v972_v22 = vpop.permute.xlu1 %971 }
 0x2f8   :  { %2393 = vtanh.bf16 %v886_v38  ;;  %v2182_v39 = vpop.f32.mrb[24].mxu0 }
 0x2f9   :  { %v853_v40 = vpop.f32.mrb[25].mxu0  ;;  %2395 = vtanh.bf16 %v887_v36  ;;  %v862_v44 = vadd.f32 %v2182_v39, %v712_v37  ;;  %v957_v20 = vpop.permute.xlu0 %956 }
 0x2fa   :  { %v2183_v41 = vpop.f32.mrb[26].mxu0  ;;  %v854_v48 = vadd.f32 %v853_v40, %v702_v26  ;;  %v982_v33 = vpop.permute.xlu1 %981 }
 0x2fb   :  { %v2390_v42 = vpop.eup %2389  ;;  %v865_v45 = vadd.f32 %v2183_v41, %v717_v35  ;;  %v856_v46 = vpop.f32.mrb[27].mxu0 }
 0x2fc   :  { %v857_v49 = vadd.f32 %v856_v46, %v707_v25  ;;  %2188 = vmatprep.subr.bf16.mxu1 %v2390_v42  ;;  %v2392_v50 = vpop.eup %2391 }
 0x2fd   :  { %v889_v51 = vpack.c.bf16 %v865_v45, %v862_v44  ;;  %2189 = vmatpush3.bf16.msra.mxu1 %v2390_v42  ;;  %v967_v24 = vpop.permute.xlu0 %966 }
 0x2fe   :  { %v888_v52 = vpack.c.bf16 %v857_v49, %v854_v48  ;;  %2190 = vmatprep.subr.bf16.mxu1 %v2392_v50 }
 0x300   :  { %2397 = vtanh.bf16 %v888_v52  ;;  %v2186_v53 = vpop.f32.mrb[28].mxu0 }
 0x301   :  { %v869_v55 = vpop.f32.mrb[29].mxu0  ;;  %2191 = vmatpush3.bf16.msra.mxu1 %v2392_v50  ;;  %2399 = vtanh.bf16 %v889_v51  ;;  %v878_v59 = vadd.f32 %v2186_v53, %v732_v56  ;;  %v977_v34 = vpop.permute.xlu0 %976 }
 0x302   :  { %v2187_v57 = vpop.f32.mrb[30].mxu0  ;;  %v870_v62 = vadd.f32 %v869_v55, %v722_v47 }
 0x303   :  { %v2394_v58 = vpop.eup %2393  ;;  %v881_v60 = vadd.f32 %v2187_v57, %v737_v54  ;;  %v872_v61 = vpop.f32.mrb[31].mxu0 }
 0x304   :  { %v873_v63 = vadd.f32 %v872_v61, %v727_v43  ;;  %2192 = vmatprep.subr.bf16.mxu1 %v2394_v58  ;;  %v2396_v0 = vpop.eup %2395  ;;  %v992_v43 = vpop.permute.xlu1 %991 }
 0x305   :  { %v891_v1 = vpack.c.bf16 %v881_v60, %v878_v59  ;;  %2193 = vmatpush3.bf16.msra.mxu1 %v2394_v58  ;;  %v987_v45 = vpop.permute.xlu0 %986 }
 0x306   :  { %v890_v2 = vpack.c.bf16 %v873_v63, %v870_v62  ;;  %2194 = vmatprep.subr.bf16.mxu1 %v2396_v0 }
 0x308   :  { %2401 = vtanh.bf16 %v890_v2  ;;  %v1002_v51 = vpop.permute.xlu1 %1001 }
 0x309   :  { %2195 = vmatpush3.bf16.msra.mxu1 %v2396_v0  ;;  %2403 = vtanh.bf16 %v891_v1  ;;  %v997_v55 = vpop.permute.xlu0 %996 }
 0x30b   :  { %v2398_v3 = vpop.eup %2397 }
 0x30c   :  { %2196 = vmatprep.subr.bf16.mxu1 %v2398_v3  ;;  %v2400_v4 = vpop.eup %2399  ;;  %v1012_v62 = vpop.permute.xlu1 %1011 }
 0x30d   :  { %2197 = vmatpush3.bf16.msra.mxu1 %v2398_v3  ;;  %v1007_v0 = vpop.permute.xlu0 %1006 }
 0x30e   :  { %2198 = vmatprep.subr.bf16.mxu1 %v2400_v4 }
 0x311   :  { %2199 = vmatpush3.bf16.msra.mxu1 %v2400_v4 }
 0x313   :  { %v2402_v5 = vpop.eup %2401 }
 0x314   :  { %2200 = vmatprep.subr.bf16.mxu1 %v2402_v5  ;;  %v2404_v6 = vpop.eup %2403 }
 0x315   :  { %2201 = vmatpush3.bf16.msra.mxu1 %v2402_v5 }
 0x316   :  { %2202 = vmatprep.subr.bf16.mxu1 %v2404_v6 }
 0x319   :  { %2203 = vmatpush3.bf16.msra.mxu1 %v2404_v6 }
 0x31c   :  { %2205 = vmatmul.mubr.bf16.vlgmr.msra.gmra.mrb[16].mxu1 %v2333_v7 }
 0x31d   :  { %2208 = vmatprep.mubr.bf16.mxu1 %v2334_v8 }
 0x324   :  { %2209 = vmatmul.mubr.bf16.gmra.mrb[20].mxu1 %v2335_v9 }
 0x325   :  { %2212 = vmatprep.mubr.bf16.mxu1 %v2336_v10 }
 0x32c   :  { %2213 = vmatmul.mubr.bf16.gmra.mrb[24].mxu1 %v2337_v11 }
 0x32d   :  { %2216 = vmatprep.mubr.bf16.mxu1 %v2338_v12 }
 0x334   :  { %2217 = vmatmul.mubr.bf16.gmra.mrb[28].mxu1 %v2339_v13 }
 0x3ef   :  { %v2206_v21 = vpop.f32.mrb[16].mxu1 }
 0x3f0   :  { %v1096_v23 = vpop.f32.mrb[17].mxu1  ;;  %v1105_v26 = vadd.f32 %v2206_v21, %v947_v18  ;;  %v2344_v18 = vld [vmem:[%s3034_s3 + $0xe0] sm:$0xff]   ;;  %v2347_v21 = vld [vmem:[%s3034_s3 + $0xf8] sm:$0xff]  }
 0x3f1   :  { %v2207_v25 = vpop.f32.mrb[18].mxu1  ;;  %v1097_v29 = vadd.f32 %v1096_v23, %v937_v16  ;;  %v2342_v16 = vld [vmem:[%s3034_s3 + $0xd0] sm:$0xff]   ;;  %v1217_v23 = vpop.permute.xlu1 %1216 }
 0x3f2   :  { %v1108_v27 = vadd.f32 %v2207_v25, %v952_v17  ;;  %v1099_v28 = vpop.f32.mrb[19].mxu1  ;;  %v2343_v17 = vld [vmem:[%s3034_s3 + $0xd8] sm:$0xff]  }
 0x3f3   :  { %v1100_v30 = vadd.f32 %v1099_v28, %v942_v15  ;;  %v2341_v15 = vld [vmem:[%s3034_s3 + $0xc8] sm:$0xff]  }
 0x3f4   :  { %v1160_v31 = vpack.c.bf16 %v1108_v27, %v1105_v26 }
 0x3f5   :  { %v1159_v32 = vpack.c.bf16 %v1100_v30, %v1097_v29  ;;  %v1227_v25 = vpop.permute.xlu1 %1226 }
 0x3f7   :  { %2405 = vtanh.bf16 %v1159_v32  ;;  %v2210_v35 = vpop.f32.mrb[20].mxu1 }
 0x3f8   :  { %v1112_v36 = vpop.f32.mrb[21].mxu1  ;;  %2407 = vtanh.bf16 %v1160_v31  ;;  %v1121_v38 = vadd.f32 %v2210_v35, %v967_v24  ;;  %v1212_v24 = vpop.permute.xlu0 %1211 }
 0x3f9   :  { %v2211_v37 = vpop.f32.mrb[22].mxu1  ;;  %v1113_v41 = vadd.f32 %v1112_v36, %v957_v20  ;;  %v2346_v20 = vld [vmem:[%s3034_s3 + $0xf0] sm:$0xff]   ;;  %v1237_v27 = vpop.permute.xlu1 %1236 }
 0x3fa   :  { %v1124_v39 = vadd.f32 %v2211_v37, %v972_v22  ;;  %v1115_v40 = vpop.f32.mrb[23].mxu1  ;;  %v2348_v22 = vld [vmem:[%s3034_s3 + $0x100] sm:$0xff]  }
 0x3fb   :  { %v1116_v42 = vadd.f32 %v1115_v40, %v962_v19  ;;  %v2345_v19 = vld [vmem:[%s3034_s3 + $0xe8] sm:$0xff]   ;;  %2268 = vmatprep.mubr.bf16.mxu1 %v2348_v22 }
 0x3fc   :  { %v1162_v44 = vpack.c.bf16 %v1124_v39, %v1121_v38  ;;  %v1222_v26 = vpop.permute.xlu0 %1221 }
 0x3fd   :  { %v1161_v46 = vpack.c.bf16 %v1116_v42, %v1113_v41  ;;  %v1247_v30 = vpop.permute.xlu1 %1246 }
 0x3ff   :  { %2409 = vtanh.bf16 %v1161_v46  ;;  %v2214_v47 = vpop.f32.mrb[24].mxu1 }
 0x400   :  { %v1128_v48 = vpop.f32.mrb[25].mxu1  ;;  %2411 = vtanh.bf16 %v1162_v44  ;;  %v1137_v52 = vadd.f32 %v2214_v47, %v987_v45  ;;  %v1232_v28 = vpop.permute.xlu0 %1231 }
 0x401   :  { %v2215_v49 = vpop.f32.mrb[26].mxu1  ;;  %v1129_v56 = vadd.f32 %v1128_v48, %v977_v34  ;;  %v1257_v41 = vpop.permute.xlu1 %1256 }
 0x402   :  { %v2406_v50 = vpop.eup %2405  ;;  %v1140_v53 = vadd.f32 %v2215_v49, %v992_v43  ;;  %v1131_v54 = vpop.f32.mrb[27].mxu1 }
 0x403   :  { %v1132_v57 = vadd.f32 %v1131_v54, %v982_v33  ;;  %2220 = vmatprep.subr.bf16.mxu0 %v2406_v50  ;;  %v2408_v58 = vpop.eup %2407 }
 0x404   :  { %v1164_v59 = vpack.c.bf16 %v1140_v53, %v1137_v52  ;;  %2221 = vmatpush3.bf16.msra.mxu0 %v2406_v50  ;;  %v1242_v32 = vpop.permute.xlu0 %1241 }
 0x405   :  { %v1163_v60 = vpack.c.bf16 %v1132_v57, %v1129_v56  ;;  %2222 = vmatprep.subr.bf16.mxu0 %v2408_v58 }
 0x407   :  { %2413 = vtanh.bf16 %v1163_v60  ;;  %v2218_v61 = vpop.f32.mrb[28].mxu1 }
 0x408   :  { %v1144_v63 = vpop.f32.mrb[29].mxu1  ;;  %2223 = vmatpush3.bf16.msra.mxu0 %v2408_v58  ;;  %2415 = vtanh.bf16 %v1164_v59  ;;  %v1153_v3 = vadd.f32 %v2218_v61, %v1007_v0  ;;  %v1252_v42 = vpop.permute.xlu0 %1251 }
 0x409   :  { %v2219_v1 = vpop.f32.mrb[30].mxu1  ;;  %v1145_v6 = vadd.f32 %v1144_v63, %v997_v55 }
 0x40a   :  { %v2410_v2 = vpop.eup %2409  ;;  %v1156_v4 = vadd.f32 %v2219_v1, %v1012_v62  ;;  %v1147_v5 = vpop.f32.mrb[31].mxu1 }
 0x40b   :  { %v1148_v7 = vadd.f32 %v1147_v5, %v1002_v51  ;;  %2224 = vmatprep.subr.bf16.mxu0 %v2410_v2  ;;  %v2412_v8 = vpop.eup %2411  ;;  %v1267_v51 = vpop.permute.xlu1 %1266 }
 0x40c   :  { %v1166_v9 = vpack.c.bf16 %v1156_v4, %v1153_v3  ;;  %2225 = vmatpush3.bf16.msra.mxu0 %v2410_v2  ;;  %v1262_v53 = vpop.permute.xlu0 %1261 }
 0x40d   :  { %v1165_v10 = vpack.c.bf16 %v1148_v7, %v1145_v6  ;;  %2226 = vmatprep.subr.bf16.mxu0 %v2412_v8 }
 0x40f   :  { %2417 = vtanh.bf16 %v1165_v10  ;;  %v1277_v59 = vpop.permute.xlu1 %1276 }
 0x410   :  { %2227 = vmatpush3.bf16.msra.mxu0 %v2412_v8  ;;  %2419 = vtanh.bf16 %v1166_v9  ;;  %v1272_v63 = vpop.permute.xlu0 %1271 }
 0x412   :  { %v2414_v11 = vpop.eup %2413 }
 0x413   :  { %2228 = vmatprep.subr.bf16.mxu0 %v2414_v11  ;;  %v2416_v12 = vpop.eup %2415  ;;  %v1287_v6 = vpop.permute.xlu1 %1286 }
 0x414   :  { %2229 = vmatpush3.bf16.msra.mxu0 %v2414_v11  ;;  %v1282_v8 = vpop.permute.xlu0 %1281 }
 0x415   :  { %2230 = vmatprep.subr.bf16.mxu0 %v2416_v12 }
 0x418   :  { %2231 = vmatpush3.bf16.msra.mxu0 %v2416_v12 }
 0x41a   :  { %v2418_v13 = vpop.eup %2417 }
 0x41b   :  { %2232 = vmatprep.subr.bf16.mxu0 %v2418_v13  ;;  %v2420_v14 = vpop.eup %2419 }
 0x41c   :  { %2233 = vmatpush3.bf16.msra.mxu0 %v2418_v13 }
 0x41d   :  { %2234 = vmatprep.subr.bf16.mxu0 %v2420_v14 }
 0x420   :  { %2235 = vmatpush3.bf16.msra.mxu0 %v2420_v14 }
 0x423   :  { %2237 = vmatmul.mubr.bf16.vlgmr.msra.gmra.mrb[32].mxu0 %v2341_v15 }
 0x424   :  { %2240 = vmatprep.mubr.bf16.mxu0 %v2342_v16 }
 0x42b   :  { %2241 = vmatmul.mubr.bf16.gmra.mrb[36].mxu0 %v2343_v17 }
 0x42c   :  { %2244 = vmatprep.mubr.bf16.mxu0 %v2344_v18 }
 0x433   :  { %2245 = vmatmul.mubr.bf16.gmra.mrb[40].mxu0 %v2345_v19 }
 0x434   :  { %2248 = vmatprep.mubr.bf16.mxu0 %v2346_v20 }
 0x43b   :  { %2249 = vmatmul.mubr.bf16.gmra.mrb[44].mxu0 %v2347_v21 }
 0x4f6   :  { %v2238_v29 = vpop.f32.mrb[32].mxu0 }
 0x4f7   :  { %v1371_v31 = vpop.f32.mrb[33].mxu0  ;;  %v1380_v34 = vadd.f32 %v2238_v29, %v1222_v26  ;;  %v2352_v26 = vld [vmem:[%s3034_s3 + $0x120] sm:$0xff]   ;;  %v2355_v29 = vld [vmem:[%s3034_s3 + $0x138] sm:$0xff]  }
 0x4f8   :  { %v2239_v33 = vpop.f32.mrb[34].mxu0  ;;  %v1372_v37 = vadd.f32 %v1371_v31, %v1212_v24  ;;  %v2350_v24 = vld [vmem:[%s3034_s3 + $0x110] sm:$0xff]   ;;  %v1492_v31 = vpop.permute.xlu1 %1491 }
 0x4f9   :  { %v1383_v35 = vadd.f32 %v2239_v33, %v1227_v25  ;;  %v1374_v36 = vpop.f32.mrb[35].mxu0  ;;  %v2351_v25 = vld [vmem:[%s3034_s3 + $0x118] sm:$0xff]  }
 0x4fa   :  { %v1375_v38 = vadd.f32 %v1374_v36, %v1217_v23  ;;  %v2349_v23 = vld [vmem:[%s3034_s3 + $0x108] sm:$0xff]  }
 0x4fb   :  { %v1435_v39 = vpack.c.bf16 %v1383_v35, %v1380_v34 }
 0x4fc   :  { %v1434_v40 = vpack.c.bf16 %v1375_v38, %v1372_v37  ;;  %v1502_v33 = vpop.permute.xlu1 %1501 }
 0x4fe   :  { %2421 = vtanh.bf16 %v1434_v40  ;;  %v2242_v43 = vpop.f32.mrb[36].mxu0 }
 0x4ff   :  { %v1387_v44 = vpop.f32.mrb[37].mxu0  ;;  %2423 = vtanh.bf16 %v1435_v39  ;;  %v1396_v46 = vadd.f32 %v2242_v43, %v1242_v32  ;;  %v1487_v32 = vpop.permute.xlu0 %1486 }
 0x500   :  { %v2243_v45 = vpop.f32.mrb[38].mxu0  ;;  %v1388_v49 = vadd.f32 %v1387_v44, %v1232_v28  ;;  %v2354_v28 = vld [vmem:[%s3034_s3 + $0x130] sm:$0xff]   ;;  %v1512_v35 = vpop.permute.xlu1 %1511 }
 0x501   :  { %v1399_v47 = vadd.f32 %v2243_v45, %v1247_v30  ;;  %v1390_v48 = vpop.f32.mrb[39].mxu0  ;;  %v2478_v30 = vmov 0.0  }
 0x502   :  { %v1391_v50 = vadd.f32 %v1390_v48, %v1237_v27  ;;  %v2353_v27 = vld [vmem:[%s3034_s3 + $0x128] sm:$0xff]   ;;  %2284 = vmatprep.subr.bf16.mxu0 %v2478_v30  ;;  %2300 = vmatprep.mubr.msk.bf16.mxu0 %vm2479_vm1, %v2478_v30 }
 0x503   :  { %v1437_v52 = vpack.c.bf16 %v1399_v47, %v1396_v46  ;;  %v1497_v34 = vpop.permute.xlu0 %1496 }
 0x504   :  { %v1436_v54 = vpack.c.bf16 %v1391_v50, %v1388_v49  ;;  %v1522_v38 = vpop.permute.xlu1 %1521 }
 0x506   :  { %2425 = vtanh.bf16 %v1436_v54  ;;  %v2246_v55 = vpop.f32.mrb[40].mxu0 }
 0x507   :  { %v1403_v56 = vpop.f32.mrb[41].mxu0  ;;  %2427 = vtanh.bf16 %v1437_v52  ;;  %v1412_v60 = vadd.f32 %v2246_v55, %v1262_v53  ;;  %v1507_v36 = vpop.permute.xlu0 %1506 }
 0x508   :  { %v2247_v57 = vpop.f32.mrb[42].mxu0  ;;  %v1404_v0 = vadd.f32 %v1403_v56, %v1252_v42  ;;  %v1532_v49 = vpop.permute.xlu1 %1531 }
 0x509   :  { %v2422_v58 = vpop.eup %2421  ;;  %v1415_v61 = vadd.f32 %v2247_v57, %v1267_v51  ;;  %v1406_v62 = vpop.f32.mrb[43].mxu0 }
 0x50a   :  { %v1407_v1 = vadd.f32 %v1406_v62, %v1257_v41  ;;  %2252 = vmatprep.subr.bf16.mxu1 %v2422_v58  ;;  %v2424_v2 = vpop.eup %2423 }
 0x50b   :  { %v1439_v3 = vpack.c.bf16 %v1415_v61, %v1412_v60  ;;  %2253 = vmatpush3.bf16.msra.mxu1 %v2422_v58  ;;  %v1517_v40 = vpop.permute.xlu0 %1516 }
 0x50c   :  { %v1438_v4 = vpack.c.bf16 %v1407_v1, %v1404_v0  ;;  %2254 = vmatprep.subr.bf16.mxu1 %v2424_v2 }
 0x50e   :  { %2429 = vtanh.bf16 %v1438_v4  ;;  %v2250_v5 = vpop.f32.mrb[44].mxu0 }
 0x50f   :  { %v1419_v7 = vpop.f32.mrb[45].mxu0  ;;  %2255 = vmatpush3.bf16.msra.mxu1 %v2424_v2  ;;  %2431 = vtanh.bf16 %v1439_v3  ;;  %v1428_v11 = vadd.f32 %v2250_v5, %v1282_v8  ;;  %v1527_v50 = vpop.permute.xlu0 %1526 }
 0x510   :  { %v2251_v9 = vpop.f32.mrb[46].mxu0  ;;  %v1420_v14 = vadd.f32 %v1419_v7, %v1272_v63 }
 0x511   :  { %v2426_v10 = vpop.eup %2425  ;;  %v1431_v12 = vadd.f32 %v2251_v9, %v1287_v6  ;;  %v1422_v13 = vpop.f32.mrb[47].mxu0 }
 0x512   :  { %v1423_v15 = vadd.f32 %v1422_v13, %v1277_v59  ;;  %2256 = vmatprep.subr.bf16.mxu1 %v2426_v10  ;;  %v2428_v16 = vpop.eup %2427  ;;  %v1542_v59 = vpop.permute.xlu1 %1541 }
 0x513   :  { %v1441_v17 = vpack.c.bf16 %v1431_v12, %v1428_v11  ;;  %2257 = vmatpush3.bf16.msra.mxu1 %v2426_v10  ;;  %v1537_v61 = vpop.permute.xlu0 %1536 }
 0x514   :  { %v1440_v18 = vpack.c.bf16 %v1423_v15, %v1420_v14  ;;  %2258 = vmatprep.subr.bf16.mxu1 %v2428_v16 }
 0x516   :  { %2433 = vtanh.bf16 %v1440_v18  ;;  %v1552_v3 = vpop.permute.xlu1 %1551 }
 0x517   :  { %2259 = vmatpush3.bf16.msra.mxu1 %v2428_v16  ;;  %2435 = vtanh.bf16 %v1441_v17  ;;  %v1547_v7 = vpop.permute.xlu0 %1546 }
 0x519   :  { %v2430_v19 = vpop.eup %2429 }
 0x51a   :  { %2260 = vmatprep.subr.bf16.mxu1 %v2430_v19  ;;  %v2432_v20 = vpop.eup %2431  ;;  %v1562_v14 = vpop.permute.xlu1 %1561 }
 0x51b   :  { %2261 = vmatpush3.bf16.msra.mxu1 %v2430_v19  ;;  %v1557_v16 = vpop.permute.xlu0 %1556 }
 0x51c   :  { %2262 = vmatprep.subr.bf16.mxu1 %v2432_v20 }
 0x51f   :  { %2263 = vmatpush3.bf16.msra.mxu1 %v2432_v20 }
 0x521   :  { %v2434_v21 = vpop.eup %2433 }
 0x522   :  { %2264 = vmatprep.subr.bf16.mxu1 %v2434_v21  ;;  %v2436_v22 = vpop.eup %2435 }
 0x523   :  { %2265 = vmatpush3.bf16.msra.mxu1 %v2434_v21 }
 0x524   :  { %2266 = vmatprep.subr.bf16.mxu1 %v2436_v22 }
 0x527   :  { %2267 = vmatpush3.bf16.msra.mxu1 %v2436_v22 }
 0x52a   :  { %2269 = vmatmul.mubr.bf16.vlgmr.msra.gmra.mrb[32].mxu1 %v2349_v23 }
 0x52b   :  { %2272 = vmatprep.mubr.bf16.mxu1 %v2350_v24 }
 0x532   :  { %2273 = vmatmul.mubr.bf16.gmra.mrb[36].mxu1 %v2351_v25 }
 0x533   :  { %2276 = vmatprep.mubr.bf16.mxu1 %v2352_v26 }
 0x53a   :  { %2277 = vmatmul.mubr.bf16.gmra.mrb[40].mxu1 %v2353_v27 }
 0x53b   :  { %2280 = vmatprep.mubr.bf16.mxu1 %v2354_v28 }
 0x542   :  { %2281 = vmatmul.mubr.bf16.gmra.mrb[44].mxu1 %v2355_v29 }
 0x5fd   :  { %v2270_v37 = vpop.f32.mrb[32].mxu1 }
 0x5fe   :  { %v1646_v39 = vpop.f32.mrb[33].mxu1  ;;  %v1655_v42 = vadd.f32 %v2270_v37, %v1497_v34  ;;  %v1737_v37 = vpop.permute.xlu1 %1736 }
 0x5ff   :  { %v2271_v41 = vpop.f32.mrb[34].mxu1  ;;  %v1647_v45 = vadd.f32 %v1646_v39, %v1487_v32  ;;  %v2356_v32 = vld [vmem:[%s3036_s5] sm:$0xff]  }
 0x600   :  { %v1658_v43 = vadd.f32 %v2271_v41, %v1502_v33  ;;  %v1649_v44 = vpop.f32.mrb[35].mxu1  ;;  %v1732_v33 = vpop.permute.xlu0 %1731 }
 0x601   :  { %v1650_v46 = vadd.f32 %v1649_v44, %v1492_v31 }
 0x602   :  { %v1710_v47 = vpack.c.bf16 %v1658_v43, %v1655_v42 }
 0x603   :  { %v1709_v48 = vpack.c.bf16 %v1650_v46, %v1647_v45 }
 0x605   :  { %2437 = vtanh.bf16 %v1709_v48  ;;  %v2274_v51 = vpop.f32.mrb[36].mxu1 }
 0x606   :  { %v1662_v52 = vpop.f32.mrb[37].mxu1  ;;  %v1671_v54 = vadd.f32 %v2274_v51, %v1517_v40  ;;  %2439 = vtanh.bf16 %v1710_v47 }
 0x607   :  { %v2275_v53 = vpop.f32.mrb[38].mxu1  ;;  %v1663_v57 = vadd.f32 %v1662_v52, %v1507_v36 }
 0x608   :  { %v1674_v55 = vadd.f32 %v2275_v53, %v1522_v38  ;;  %v1665_v56 = vpop.f32.mrb[39].mxu1 }
 0x609   :  { %v1666_v58 = vadd.f32 %v1665_v56, %v1512_v35 }
 0x60a   :  { %v1712_v60 = vpack.c.bf16 %v1674_v55, %v1671_v54 }
 0x60b   :  { %v1711_v62 = vpack.c.bf16 %v1666_v58, %v1663_v57 }
 0x60d   :  { %2441 = vtanh.bf16 %v1711_v62  ;;  %v2278_v63 = vpop.f32.mrb[40].mxu1 }
 0x60e   :  { %v1678_v0 = vpop.f32.mrb[41].mxu1  ;;  %v1687_v4 = vadd.f32 %v2278_v63, %v1537_v61  ;;  %2443 = vtanh.bf16 %v1712_v60 }
 0x60f   :  { %v2279_v1 = vpop.f32.mrb[42].mxu1  ;;  %v1679_v8 = vadd.f32 %v1678_v0, %v1527_v50 }
 0x610   :  { %v2438_v2 = vpop.eup %2437  ;;  %v1690_v5 = vadd.f32 %v2279_v1, %v1542_v59  ;;  %v1681_v6 = vpop.f32.mrb[43].mxu1 }
 0x611   :  { %v1682_v9 = vadd.f32 %v1681_v6, %v1532_v49  ;;  %2285 = vmatpush3.bf16.msra.mxu0 %v2438_v2  ;;  %v2440_v12 = vpop.eup %2439 }
 0x612   :  { %v1714_v10 = vpack.c.bf16 %v1690_v5, %v1687_v4  ;;  %2286 = vmatprep.subr.bf16.mxu0 %v2478_v30 }
 0x613   :  { %v1713_v11 = vpack.c.bf16 %v1682_v9, %v1679_v8 }
 0x615   :  { %2445 = vtanh.bf16 %v1713_v11  ;;  %v2282_v13 = vpop.f32.mrb[44].mxu1  ;;  %2287 = vmatpush3.bf16.msra.mxu0 %v2440_v12 }
 0x616   :  { %v1694_v15 = vpop.f32.mrb[45].mxu1  ;;  %2288 = vmatprep.subr.bf16.mxu0 %v2478_v30  ;;  %v1703_v19 = vadd.f32 %v2282_v13, %v1557_v16  ;;  %2447 = vtanh.bf16 %v1714_v10 }
 0x617   :  { %v2283_v17 = vpop.f32.mrb[46].mxu1  ;;  %v1695_v22 = vadd.f32 %v1694_v15, %v1547_v7 }
 0x618   :  { %v2442_v18 = vpop.eup %2441  ;;  %v1706_v20 = vadd.f32 %v2283_v17, %v1562_v14  ;;  %v1697_v21 = vpop.f32.mrb[47].mxu1 }
 0x619   :  { %v1698_v23 = vadd.f32 %v1697_v21, %v1552_v3  ;;  %2289 = vmatpush3.bf16.msra.mxu0 %v2442_v18  ;;  %v2444_v26 = vpop.eup %2443 }
 0x61a   :  { %v1716_v24 = vpack.c.bf16 %v1706_v20, %v1703_v19  ;;  %2290 = vmatprep.subr.bf16.mxu0 %v2478_v30 }
 0x61b   :  { %v1715_v25 = vpack.c.bf16 %v1698_v23, %v1695_v22 }
 0x61d   :  { %2449 = vtanh.bf16 %v1715_v25  ;;  %2291 = vmatpush3.bf16.msra.mxu0 %v2444_v26 }
 0x61e   :  { %2292 = vmatprep.subr.bf16.mxu0 %v2478_v30  ;;  %2451 = vtanh.bf16 %v1716_v24 }
 0x620   :  { %v2446_v27 = vpop.eup %2445 }
 0x621   :  { %2293 = vmatpush3.bf16.msra.mxu0 %v2446_v27  ;;  %v2448_v28 = vpop.eup %2447 }
 0x622   :  { %2294 = vmatprep.subr.bf16.mxu0 %v2478_v30 }
 0x625   :  { %2295 = vmatpush3.bf16.msra.mxu0 %v2448_v28 }
 0x626   :  { %2296 = vmatprep.subr.bf16.mxu0 %v2478_v30 }
 0x628   :  { %v2450_v29 = vpop.eup %2449 }
 0x629   :  { %2297 = vmatpush3.bf16.msra.mxu0 %v2450_v29  ;;  %v2452_v31 = vpop.eup %2451 }
 0x62a   :  { %2298 = vmatprep.subr.bf16.mxu0 %v2478_v30 }
 0x62d   :  { %2299 = vmatpush3.bf16.msra.mxu0 %v2452_v31 }
 0x630   :  { %2301 = vmatmul.mubr.bf16.vlgmr.msra.gmra.mrb[48].mxu0 %v2356_v32 }
 0x703   :  { %v1779_v34 = vpop.f32.mrb[48].mxu0 }
 0x704   :  { %v1780_v35 = vadd.f32 %v1779_v34, %v1732_v33  ;;  %v2302_v36 = vpop.f32.mrb[49].mxu0 }
 0x705   :  { %v1782_v38 = vpop.f32.mrb[50].mxu0 }
 0x706   :  { %1786 = vst [vmem:[#allocation2] sm:$0xff] %v1780_v35  ;;  %v1783_v39 = vadd.f32 %v1782_v38, %v1737_v37  ;;  %v2303_v40 = vpop.f32.mrb[51].mxu0 }
 0x708   :  { %1787 = vst [vmem:[#allocation2 + $0x8] sm:$0xff] %v1783_v39 }
 0x709   :  { %2464 = shalt.err (!%p2461_p4)
}
 0x70a   :  { %s2465_s28 = scalar_lea.hbm %s3038_s7, 256 }
 0x70b   :  { %p2466_p5 = scmp.ne.s32.totalorder %s3038_s7, %s2465_s28  ;;  %p2469_p6 = scmp.lt.u32.totalorder %s2465_s28, %s3038_s7 }
 0x70d   :  { %p2471_p7 = pnand %p2469_p6, %p2466_p5 }
 0x70f   :  { %2474 = shalt.err (!%p2471_p7)
}
 0x710   :  { %s2481_s30 = smov 128   ;;  %s2482_s8 = smov 8  }
 0x711   :  { %1799 = dma.vmem_to_hbm [thread:$0]  %s1794_s25, 256, %s3038_s7, [#allocation3], %s2481_s30, %s2481_s30, %s2482_s8  }
 0x712   :  { %2475 = dma.done.wait [#allocation3], 256  }
 0x713   :  { %2476 = vsyncadd [#allocation3], 4294967040 }
 0x714   :  { %1803 = vsyncpa [#allocation3], 1 }

</bundles_post_ra>
